<compile_context>
chip_gen: v5e
topology: v5e:2x2
jax: 0.10.0
libtpu: 0.0.40
codegen_flags: <defaults>
</compile_context>

<pallas_src>
import functools

import jax
import jax.numpy as jnp
from jax import lax
from jax.experimental import pallas as pl
from jax.experimental.pallas import tpu as pltpu


def _bilstm_kernel(x_ref, wih_ref, b_ref, whh_ref,
                   out_ref, h_out_ref, c_out_ref,
                   h_sc, c_sc,
                   *, Tc, H, T_valid, reverse_store, needs_mask,
                   full_unroll, unroll):
    """One grid step = one direction x one chunk of Tc time steps.

    x_ref   : (Tc, Bp, I)   input chunk (compute dtype); the backward
                            direction's stream is pre-reversed in time so
                            both directions walk rows 0..Tc-1.
    wih_ref : (I, 4H)       input->gates weights (compute dtype)
    b_ref   : (1, 4H)       folded bias b_ih + b_hh (f32)
    whh_ref : (H, 4H)       recurrent weights (compute dtype)
    out_ref : (Tc, Bp, H)   per-step hidden states (f32)
    h_out_ref, c_out_ref : (Bp, H) final states (f32)
    h_sc, c_sc : (Bp, H)    f32 state carried across chunks
    """
    dir_id = pl.program_id(0)        # 0 = forward, 1 = backward
    chunk_id = pl.program_id(1)

    @pl.when(chunk_id == 0)
    def _():
        h_sc[...] = jnp.zeros_like(h_sc)
        c_sc[...] = jnp.zeros_like(c_sc)

    wih = wih_ref[...]               # resident VMEM, hoisted out of the loop
    whh = whh_ref[...]
    bias = b_ref[...].astype(jnp.float32)
    cdt = whh.dtype

    def step(j, h, c):
        # Fused input projection + recurrence: x_t@W_ih + b + h@W_hh,
        # f32 MXU accumulation.  The x-projection dots are independent across
        # steps and fill MXU bubbles between the dependent h@W_hh dots.
        g = (jnp.dot(x_ref[j], wih, preferred_element_type=jnp.float32)
             + bias
             + jnp.dot(h.astype(cdt), whh, preferred_element_type=jnp.float32))
        # PyTorch gate order: i, f, g, o.
        i_g = jax.nn.sigmoid(g[:, 0 * H:1 * H])
        f_g = jax.nn.sigmoid(g[:, 1 * H:2 * H])
        g_g = jnp.tanh(g[:, 2 * H:3 * H])
        o_g = jax.nn.sigmoid(g[:, 3 * H:4 * H])
        c_new = f_g * c + i_g * g_g
        h_new = o_g * jnp.tanh(c_new)
        if reverse_store:
            # Direct (T, B, 2H) layout: un-reverse the backward direction at
            # store time (forward: row j; backward: row Tc-1-j).
            row = j + dir_id * (Tc - 1 - 2 * j)
        else:
            row = j
        out_ref[row] = h_new.astype(out_ref.dtype)
        if needs_mask:
            # Padded tail steps must not advance the carried state.
            valid = (chunk_id * Tc + j) < T_valid
            h_new = jnp.where(valid, h_new, h)
            c_new = jnp.where(valid, c_new, c)
        return h_new, c_new

    h, c = h_sc[...], c_sc[...]
    if full_unroll:
        for j in range(Tc):          # static offsets for every load
            h, c = step(j, h, c)
    else:
        h, c = lax.fori_loop(0, Tc, lambda j, hc: step(j, *hc), (h, c),
                             unroll=unroll)

    h_sc[...] = h
    c_sc[...] = c
    # Write finals every chunk (cheap; avoids relying on an uninitialized
    # resident output block before the last chunk).
    h_out_ref[...] = h
    c_out_ref[...] = c


def _vmem_capacity_bytes():
    try:
        return int(pltpu.get_tpu_info().vmem_capacity_bytes)
    except Exception:
        return 64 * 2 ** 20          # v7x per-TensorCore size: safe lower bound


def encoder_forward(x, params, *, compute_dtype=jnp.bfloat16,
                    tc_max=None, unroll=None):
    """Bidirectional-LSTM encoder forward.

    x: (T, B, I) float32.  Returns (output (T,B,2H) f32,
    hidden_state (2,B,H) f32, cell_state (2,B,H) f32) -- PyTorch layout.
    """
    T, B, I = x.shape
    H = params["whh_f"].shape[0]
    cdt = jnp.dtype(compute_dtype)
    cdt_b = cdt.itemsize

    # ---- batch padded to a multiple of 8 (vreg sublanes) -------------------
    Bp = ((B + 7) // 8) * 8
    x_in = x if Bp == B else jnp.pad(x, ((0, 0), (0, Bp - B), (0, 0)))

    # ---- per-generation chunk sizing from the VMEM budget ------------------
    phys_vmem = _vmem_capacity_bytes()
    budget = int(phys_vmem * 0.75)                 # headroom for Mosaic scratch
    per_tc = Bp * (2 * I * cdt_b + 2 * H * 4)      # x + out blocks, double buf
    fixed = (2 * cdt_b * (I * 4 * H + H * 4 * H)   # wih + whh (double buffered)
             + 2 * 4 * 4 * H                       # bias
             + 6 * Bp * H * 4)                     # final-state blocks + scratch
    tc = max(1, (budget - fixed) // per_tc)
    if tc_max is not None:
        tc = min(tc, tc_max)
    Tc = int(max(1, min(T, tc)))
    C = -(-T // Tc)                                # cdiv
    Tp = C * Tc
    needs_pad = Tp != T

    # ---- stacked, direction-pre-reversed input stream ----------------------
    # dir 0 = forward, dir 1 = time-reversed: both directions then walk their
    # chunk rows 0..Tc-1 with static in-chunk indexing.
    x_stack = jnp.stack([x_in, x_in[::-1]]).astype(cdt)        # (2, T, Bp, I)
    if needs_pad:
        x_stack = jnp.pad(x_stack, ((0, 0), (0, Tp - T), (0, 0), (0, 0)))
    wih = jnp.stack([params["wih_f"], params["wih_b"]]).astype(cdt)    # (2,I,4H)
    whh = jnp.stack([params["whh_f"], params["whh_b"]]).astype(cdt)    # (2,H,4H)
    b = jnp.stack([params["b_f"], params["b_b"]]).astype(jnp.float32)  # (2,1,4H)

    # ---- adaptive inner-loop unrolling --------------------------------------
    if unroll is None:
        full_unroll = (Bp * 4 * H <= 16 * 1024 and Tc <= 32) or Tc <= 2
        unroll_n = Tc if full_unroll else min(Tc, 8)
    else:
        full_unroll = int(unroll) >= Tc
        unroll_n = max(1, min(int(unroll), Tc))

    # ---- output layout: direct (T, B, 2H) when lane-aligned ----------------
    direct = (H % 128 == 0) and not needs_pad
    if direct:
        out_shape_main = jax.ShapeDtypeStruct((T, Bp, 2 * H), jnp.float32)
        out_spec_main = pl.BlockSpec(
            (Tc, Bp, H), lambda d, c: (c + d * (C - 1 - 2 * c), 0, d))
    else:
        out_shape_main = jax.ShapeDtypeStruct((2, Tp, Bp, H), jnp.float32)
        out_spec_main = pl.BlockSpec((None, Tc, Bp, H),
                                     lambda d, c: (d, c, 0, 0))

    x_spec = pl.BlockSpec((None, Tc, Bp, I), lambda d, c: (d, c, 0, 0))
    # TODO(synk): pipeline_mode=pl.Buffered(1) on the weight specs would drop
    # one redundant weight buffer (their block index is constant along the
    # chunk axis); left at default double-buffering for portability.
    wih_spec = pl.BlockSpec((None, I, 4 * H), lambda d, c: (d, 0, 0))
    b_spec = pl.BlockSpec((None, 1, 4 * H), lambda d, c: (d, 0, 0))
    whh_spec = pl.BlockSpec((None, H, 4 * H), lambda d, c: (d, 0, 0))
    fin_spec = pl.BlockSpec((None, Bp, H), lambda d, c: (d, 0, 0))

    kernel = functools.partial(
        _bilstm_kernel, Tc=Tc, H=H, T_valid=T, reverse_store=direct,
        needs_mask=needs_pad, full_unroll=full_unroll, unroll=unroll_n)

    flops = 2 * T * Bp * (2 * I * 4 * H + 2 * H * 4 * H) + 2 * T * Bp * 10 * H
    transcendentals = 2 * T * Bp * 5 * H
    bytes_accessed = (x_stack.size * cdt_b + wih.size * cdt_b
                      + whh.size * cdt_b + b.size * 4
                      + (2 * Tp * Bp * H + 4 * Bp * H) * 4)
    cost = pl.CostEstimate(flops=int(flops),
                           transcendentals=int(transcendentals),
                           bytes_accessed=int(bytes_accessed))

    vmem_limit = max(32 * 2 ** 20, int(phys_vmem * 0.85))

    out_main, h_out, c_out = pl.pallas_call(
        kernel,
        out_shape=(out_shape_main,
                   jax.ShapeDtypeStruct((2, Bp, H), jnp.float32),
                   jax.ShapeDtypeStruct((2, Bp, H), jnp.float32)),
        grid_spec=pltpu.PrefetchScalarGridSpec(
            num_scalar_prefetch=0,
            grid=(2, C),
            in_specs=[x_spec, wih_spec, b_spec, whh_spec],
            out_specs=[out_spec_main, fin_spec, fin_spec],
            scratch_shapes=[
                pltpu.VMEM((Bp, H), jnp.float32),   # carried h
                pltpu.VMEM((Bp, H), jnp.float32),   # carried c
            ],
        ),
        compiler_params=pltpu.CompilerParams(
            # Direction axis parallel (maps to the two TensorCores on v7x);
            # the chunk axis is the sequential recurrence.
            dimension_semantics=("parallel", "arbitrary"),
            vmem_limit_bytes=vmem_limit),
        cost_estimate=cost,
    )(x_stack, wih, b, whh)

    if direct:
        output = out_main
    else:
        out_f = out_main[0, :T]
        out_b = out_main[1, :T][::-1]        # un-reverse the backward direction
        output = jnp.concatenate([out_f, out_b], axis=-1)
    if Bp != B:
        output = output[:, :B]
        h_out = h_out[:, :B]
        c_out = c_out[:, :B]
    return output, h_out, c_out


# ---------------- pure-JAX reference (for correctness check) ----------------
def _lstm_cell_ref(x, h, c, wih, whh, b, H):
    gates = (jnp.dot(x, wih, preferred_element_type=jnp.float32)
             + jnp.dot(h, whh, preferred_element_type=jnp.float32)
             + b)
    i = jax.nn.sigmoid(gates[:, 0 * H:1 * H])
    f = jax.nn.sigmoid(gates[:, 1 * H:2 * H])
    g = jnp.tanh(gates[:, 2 * H:3 * H])
    o = jax.nn.sigmoid(gates[:, 3 * H:4 * H])
    c_new = f * c + i * g
    h_new = o * jnp.tanh(c_new)
    return h_new, c_new


def _lstm_ref_dir(x, wih, whh, b, H):
    B = x.shape[1]

    def step(carry, xt):
        h, c = carry
        h, c = _lstm_cell_ref(xt, h, c, wih, whh, b, H)
        return (h, c), h

    init = (jnp.zeros((B, H), jnp.float32), jnp.zeros((B, H), jnp.float32))
    (h, c), hs = lax.scan(step, init, x)
    return hs, h, c


def encoder_ref(x, params):
    H = params["whh_f"].shape[0]
    hs_f, hf, cf = _lstm_ref_dir(x, params["wih_f"], params["whh_f"],
                                 params["b_f"], H)
    hs_b, hb, cb = _lstm_ref_dir(x[::-1], params["wih_b"], params["whh_b"],
                                 params["b_b"], H)
    hs_b = hs_b[::-1]
    output = jnp.concatenate([hs_f, hs_b], axis=-1)
    return output, jnp.stack([hf, hb]), jnp.stack([cf, cb])


# ---------------------------------------------------------------------------
def init_params(key, input_size, hidden_size):
    """Deterministic PyTorch-style uniform(-1/sqrt(H), 1/sqrt(H)) init."""
    k = 1.0 / jnp.sqrt(jnp.float32(hidden_size))
    keys = jax.random.split(key, 8)
    u = lambda kk, shape: jax.random.uniform(kk, shape, jnp.float32, -k, k)
    I, H = input_size, hidden_size
    return {
        # pre-transposed: (I, 4H), (H, 4H); bias = b_ih + b_hh folded -> (1,4H)
        "wih_f": u(keys[0], (I, 4 * H)),
        "whh_f": u(keys[1], (H, 4 * H)),
        "b_f":   u(keys[2], (1, 4 * H)) + u(keys[3], (1, 4 * H)),
        "wih_b": u(keys[4], (I, 4 * H)),
        "whh_b": u(keys[5], (H, 4 * H)),
        "b_b":   u(keys[6], (1, 4 * H)) + u(keys[7], (1, 4 * H)),
    }


if __name__ == "__main__":
    def run_case(name, T, B, I, H, *, compute_dtype, tc_max=None, unroll=None,
                 atol=2e-2, rtol=2e-2):
        key = jax.random.PRNGKey(0)
        kx, kp = jax.random.split(key)
        x = jax.random.normal(kx, (T, B, I), jnp.float32)
        params = init_params(kp, I, H)
        out, h_n, c_n = jax.block_until_ready(
            encoder_forward(x, params, compute_dtype=compute_dtype,
                            tc_max=tc_max, unroll=unroll))
        out_r, h_r, c_r = encoder_ref(x, params)
        assert out.shape == (T, B, 2 * H), name
        assert h_n.shape == (2, B, H), name
        assert c_n.shape == (2, B, H), name
        assert jnp.allclose(out, out_r, rtol=rtol, atol=atol), name
        assert jnp.allclose(h_n, h_r, rtol=rtol, atol=atol), name
        assert jnp.allclose(c_n, c_r, rtol=rtol, atol=atol), name

    # Primary small config: seq=8, batch=4, input=32, hidden=32 (bf16 path,
    # fused projection, single chunk, per-direction output + concat).
    run_case("base_bf16", T=8, B=4, I=32, H=32,
             compute_dtype=jnp.bfloat16, atol=2e-2, rtol=2e-2)
    # Lane-aligned hidden (H=128): direct (T,B,2H) output layout, multi-chunk.
    run_case("direct_out_bf16", T=8, B=4, I=16, H=128,
             compute_dtype=jnp.bfloat16, tc_max=4, atol=2e-2, rtol=2e-2)
    # Non-divisible seq length: padded + masked tail, partial-unroll loop, f32.
    run_case("padded_f32", T=10, B=4, I=32, H=32,
             compute_dtype=jnp.float32, tc_max=4, unroll=2,
             atol=1e-4, rtol=1e-4)

    print("KERNEL_OK")
</pallas_src>

<mosaic_0001>
module attributes {stable_mosaic.version = 11 : i64} {
  func.func @_bilstm_kernel(%arg0: i32, %arg1: i32, %arg2: memref<1x8x8x32xbf16, #tpu.memory_space<vmem>>, %arg3: memref<1x32x128xbf16, #tpu.memory_space<vmem>>, %arg4: memref<1x1x128xf32, #tpu.memory_space<vmem>>, %arg5: memref<1x32x128xbf16, #tpu.memory_space<vmem>>, %arg6: memref<1x8x8x32xf32, #tpu.memory_space<vmem>>, %arg7: memref<1x8x32xf32, #tpu.memory_space<vmem>>, %arg8: memref<1x8x32xf32, #tpu.memory_space<vmem>>, %arg9: memref<8x32xf32, #tpu.memory_space<vmem>>, %arg10: memref<8x32xf32, #tpu.memory_space<vmem>>) attributes {dimension_semantics = [#tpu.dimension_semantics<parallel>, #tpu.dimension_semantics<arbitrary>], iteration_bounds = array<i64: 2, 1>, scalar_prefetch = 0 : i64, scratch_operands = 2 : i64, tpu.core_type = #tpu.core_type<tc>, window_params = [{transform_indices = @transform_0, window_bounds = array<i64: 1, 8, 8, 32>}, {transform_indices = @transform_1, window_bounds = array<i64: 1, 32, 128>}, {transform_indices = @transform_2, window_bounds = array<i64: 1, 1, 128>}, {transform_indices = @transform_3, window_bounds = array<i64: 1, 32, 128>}, {transform_indices = @transform_4, window_bounds = array<i64: 1, 8, 8, 32>}, {transform_indices = @transform_5, window_bounds = array<i64: 1, 8, 32>}, {transform_indices = @transform_6, window_bounds = array<i64: 1, 8, 32>}]} {
    %c0_i32 = arith.constant 0 : i32
    %0 = arith.cmpi eq, %arg1, %c0_i32 : i32
    %1 = arith.extui %0 : i1 to i32
    %c0_i32_0 = arith.constant 0 : i32
    %2 = arith.cmpi ne, %1, %c0_i32_0 : i32
    scf.if %2 {
      %cst_119 = arith.constant 0.000000e+00 : f32
      %307 = vector.broadcast %cst_119 : f32 to vector<8x32xf32>
      %c0_120 = arith.constant 0 : index
      %c0_121 = arith.constant 0 : index
      %308 = vector.load %arg9[%c0_120, %c0_121] : memref<8x32xf32, #tpu.memory_space<vmem>>, vector<8x32xf32>
      tpu.vector_store %arg9[%c0_120, %c0_121], %307 {strides = array<i32>} : memref<8x32xf32, #tpu.memory_space<vmem>>, vector<8x32xf32>,
      %cst_122 = arith.constant 0.000000e+00 : f32
      %309 = vector.broadcast %cst_122 : f32 to vector<8x32xf32>
      %c0_123 = arith.constant 0 : index
      %c0_124 = arith.constant 0 : index
      %310 = vector.load %arg10[%c0_123, %c0_124] : memref<8x32xf32, #tpu.memory_space<vmem>>, vector<8x32xf32>
      tpu.vector_store %arg10[%c0_123, %c0_124], %309 {strides = array<i32>} : memref<8x32xf32, #tpu.memory_space<vmem>>, vector<8x32xf32>,
    } else {
    }
    %c0 = arith.constant 0 : index
    %c0_1 = arith.constant 0 : index
    %c0_2 = arith.constant 0 : index
    %3 = vector.load %arg3[%c0, %c0_1, %c0_2] : memref<1x32x128xbf16, #tpu.memory_space<vmem>>, vector<1x32x128xbf16>
    %4 = vector.shape_cast %3 : vector<1x32x128xbf16> to vector<32x128xbf16>
    %c0_3 = arith.constant 0 : index
    %c0_4 = arith.constant 0 : index
    %c0_5 = arith.constant 0 : index
    %5 = vector.load %arg5[%c0_3, %c0_4, %c0_5] : memref<1x32x128xbf16, #tpu.memory_space<vmem>>, vector<1x32x128xbf16>
    %6 = vector.shape_cast %5 : vector<1x32x128xbf16> to vector<32x128xbf16>
    %c0_6 = arith.constant 0 : index
    %c0_7 = arith.constant 0 : index
    %c0_8 = arith.constant 0 : index
    %7 = vector.load %arg4[%c0_6, %c0_7, %c0_8] : memref<1x1x128xf32, #tpu.memory_space<vmem>>, vector<1x1x128xf32>
    %8 = vector.shape_cast %7 : vector<1x1x128xf32> to vector<1x128xf32>
    %c0_9 = arith.constant 0 : index
    %c0_10 = arith.constant 0 : index
    %9 = vector.load %arg9[%c0_9, %c0_10] : memref<8x32xf32, #tpu.memory_space<vmem>>, vector<8x32xf32>
    %c0_11 = arith.constant 0 : index
    %c0_12 = arith.constant 0 : index
    %10 = vector.load %arg10[%c0_11, %c0_12] : memref<8x32xf32, #tpu.memory_space<vmem>>, vector<8x32xf32>
    %c0_13 = arith.constant 0 : index
    %c0_14 = arith.constant 0 : index
    %c0_15 = arith.constant 0 : index
    %c0_16 = arith.constant 0 : index
    %11 = vector.load %arg2[%c0_13, %c0_14, %c0_15, %c0_16] : memref<1x8x8x32xbf16, #tpu.memory_space<vmem>>, vector<1x1x8x32xbf16>
    %12 = vector.shape_cast %11 : vector<1x1x8x32xbf16> to vector<8x32xbf16>
    %cst = arith.constant dense<0.000000e+00> : vector<8x128xf32>
    %13 = tpu.matmul %12, %4, %cst {dimension_numbers = #tpu.dot_dimension_numbers<[1], [0], [0], [1], [0, 0, 1, 1], [], []>} : vector<8x32xbf16>, vector<32x128xbf16>, vector<8x128xf32> -> vector<8x128xf32>
    %14 = vector.broadcast %8 : vector<1x128xf32> to vector<8x128xf32>
    %15 = arith.addf %13, %14 : vector<8x128xf32>
    %16 = arith.truncf %9 : vector<8x32xf32> to vector<8x32xbf16>
    %cst_17 = arith.constant dense<0.000000e+00> : vector<8x128xf32>
    %17 = tpu.matmul %16, %6, %cst_17 {dimension_numbers = #tpu.dot_dimension_numbers<[1], [0], [0], [1], [0, 0, 1, 1], [], []>} : vector<8x32xbf16>, vector<32x128xbf16>, vector<8x128xf32> -> vector<8x128xf32>
    %18 = arith.addf %15, %17 : vector<8x128xf32>
    %19 = vector.extract_strided_slice %18 {offsets = [0, 0], sizes = [8, 32], strides = [1, 1]} : vector<8x128xf32> to vector<8x32xf32>
    %20 = arith.negf %19 : vector<8x32xf32>
    %21 = math.exp %20 : vector<8x32xf32>
    %cst_18 = arith.constant 1.000000e+00 : f32
    %22 = vector.broadcast %cst_18 : f32 to vector<8x32xf32>
    %23 = arith.addf %22, %21 : vector<8x32xf32>
    %24 = arith.divf %22, %23 : vector<8x32xf32>
    %25 = vector.extract_strided_slice %18 {offsets = [0, 32], sizes = [8, 32], strides = [1, 1]} : vector<8x128xf32> to vector<8x32xf32>
    %26 = arith.negf %25 : vector<8x32xf32>
    %27 = math.exp %26 : vector<8x32xf32>
    %cst_19 = arith.constant 1.000000e+00 : f32
    %28 = vector.broadcast %cst_19 : f32 to vector<8x32xf32>
    %29 = arith.addf %28, %27 : vector<8x32xf32>
    %30 = arith.divf %28, %29 : vector<8x32xf32>
    %31 = vector.extract_strided_slice %18 {offsets = [0, 64], sizes = [8, 32], strides = [1, 1]} : vector<8x128xf32> to vector<8x32xf32>
    %32 = math.tanh %31 : vector<8x32xf32>
    %33 = vector.extract_strided_slice %18 {offsets = [0, 96], sizes = [8, 32], strides = [1, 1]} : vector<8x128xf32> to vector<8x32xf32>
    %34 = arith.negf %33 : vector<8x32xf32>
    %35 = math.exp %34 : vector<8x32xf32>
    %cst_20 = arith.constant 1.000000e+00 : f32
    %36 = vector.broadcast %cst_20 : f32 to vector<8x32xf32>
    %37 = arith.addf %36, %35 : vector<8x32xf32>
    %38 = arith.divf %36, %37 : vector<8x32xf32>
    %39 = arith.mulf %30, %10 : vector<8x32xf32>
    %40 = arith.mulf %24, %32 : vector<8x32xf32>
    %41 = arith.addf %39, %40 : vector<8x32xf32>
    %42 = math.tanh %41 : vector<8x32xf32>
    %43 = arith.mulf %38, %42 : vector<8x32xf32>
    %c0_21 = arith.constant 0 : index
    %c0_22 = arith.constant 0 : index
    %c0_23 = arith.constant 0 : index
    %c0_24 = arith.constant 0 : index
    %44 = vector.load %arg6[%c0_21, %c0_22, %c0_23, %c0_24] : memref<1x8x8x32xf32, #tpu.memory_space<vmem>>, vector<1x1x8x32xf32>
    %45 = vector.shape_cast %44 : vector<1x1x8x32xf32> to vector<8x32xf32>
    %46 = vector.shape_cast %43 : vector<8x32xf32> to vector<1x1x8x32xf32>
    tpu.vector_store %arg6[%c0_21, %c0_22, %c0_23, %c0_24], %46 {strides = array<i32>} : memref<1x8x8x32xf32, #tpu.memory_space<vmem>>, vector<1x1x8x32xf32>,
    %c0_25 = arith.constant 0 : index
    %c1 = arith.constant 1 : index
    %c0_26 = arith.constant 0 : index
    %c0_27 = arith.constant 0 : index
    %47 = vector.load %arg2[%c0_25, %c1, %c0_26, %c0_27] : memref<1x8x8x32xbf16, #tpu.memory_space<vmem>>, vector<1x1x8x32xbf16>
    %48 = vector.shape_cast %47 : vector<1x1x8x32xbf16> to vector<8x32xbf16>
    %cst_28 = arith.constant dense<0.000000e+00> : vector<8x128xf32>
    %49 = tpu.matmul %48, %4, %cst_28 {dimension_numbers = #tpu.dot_dimension_numbers<[1], [0], [0], [1], [0, 0, 1, 1], [], []>} : vector<8x32xbf16>, vector<32x128xbf16>, vector<8x128xf32> -> vector<8x128xf32>
    %50 = vector.broadcast %8 : vector<1x128xf32> to vector<8x128xf32>
    %51 = arith.addf %49, %50 : vector<8x128xf32>
    %52 = arith.truncf %43 : vector<8x32xf32> to vector<8x32xbf16>
    %cst_29 = arith.constant dense<0.000000e+00> : vector<8x128xf32>
    %53 = tpu.matmul %52, %6, %cst_29 {dimension_numbers = #tpu.dot_dimension_numbers<[1], [0], [0], [1], [0, 0, 1, 1], [], []>} : vector<8x32xbf16>, vector<32x128xbf16>, vector<8x128xf32> -> vector<8x128xf32>
    %54 = arith.addf %51, %53 : vector<8x128xf32>
    %55 = vector.extract_strided_slice %54 {offsets = [0, 0], sizes = [8, 32], strides = [1, 1]} : vector<8x128xf32> to vector<8x32xf32>
    %56 = arith.negf %55 : vector<8x32xf32>
    %57 = math.exp %56 : vector<8x32xf32>
    %cst_30 = arith.constant 1.000000e+00 : f32
    %58 = vector.broadcast %cst_30 : f32 to vector<8x32xf32>
    %59 = arith.addf %58, %57 : vector<8x32xf32>
    %60 = arith.divf %58, %59 : vector<8x32xf32>
    %61 = vector.extract_strided_slice %54 {offsets = [0, 32], sizes = [8, 32], strides = [1, 1]} : vector<8x128xf32> to vector<8x32xf32>
    %62 = arith.negf %61 : vector<8x32xf32>
    %63 = math.exp %62 : vector<8x32xf32>
    %cst_31 = arith.constant 1.000000e+00 : f32
    %64 = vector.broadcast %cst_31 : f32 to vector<8x32xf32>
    %65 = arith.addf %64, %63 : vector<8x32xf32>
    %66 = arith.divf %64, %65 : vector<8x32xf32>
    %67 = vector.extract_strided_slice %54 {offsets = [0, 64], sizes = [8, 32], strides = [1, 1]} : vector<8x128xf32> to vector<8x32xf32>
    %68 = math.tanh %67 : vector<8x32xf32>
    %69 = vector.extract_strided_slice %54 {offsets = [0, 96], sizes = [8, 32], strides = [1, 1]} : vector<8x128xf32> to vector<8x32xf32>
    %70 = arith.negf %69 : vector<8x32xf32>
    %71 = math.exp %70 : vector<8x32xf32>
    %cst_32 = arith.constant 1.000000e+00 : f32
    %72 = vector.broadcast %cst_32 : f32 to vector<8x32xf32>
    %73 = arith.addf %72, %71 : vector<8x32xf32>
    %74 = arith.divf %72, %73 : vector<8x32xf32>
    %75 = arith.mulf %66, %41 : vector<8x32xf32>
    %76 = arith.mulf %60, %68 : vector<8x32xf32>
    %77 = arith.addf %75, %76 : vector<8x32xf32>
    %78 = math.tanh %77 : vector<8x32xf32>
    %79 = arith.mulf %74, %78 : vector<8x32xf32>
    %c0_33 = arith.constant 0 : index
    %c1_34 = arith.constant 1 : index
    %c0_35 = arith.constant 0 : index
    %c0_36 = arith.constant 0 : index
    %80 = vector.load %arg6[%c0_33, %c1_34, %c0_35, %c0_36] : memref<1x8x8x32xf32, #tpu.memory_space<vmem>>, vector<1x1x8x32xf32>
    %81 = vector.shape_cast %80 : vector<1x1x8x32xf32> to vector<8x32xf32>
    %82 = vector.shape_cast %79 : vector<8x32xf32> to vector<1x1x8x32xf32>
    tpu.vector_store %arg6[%c0_33, %c1_34, %c0_35, %c0_36], %82 {strides = array<i32>} : memref<1x8x8x32xf32, #tpu.memory_space<vmem>>, vector<1x1x8x32xf32>,
    %c0_37 = arith.constant 0 : index
    %c2 = arith.constant 2 : index
    %c0_38 = arith.constant 0 : index
    %c0_39 = arith.constant 0 : index
    %83 = vector.load %arg2[%c0_37, %c2, %c0_38, %c0_39] : memref<1x8x8x32xbf16, #tpu.memory_space<vmem>>, vector<1x1x8x32xbf16>
    %84 = vector.shape_cast %83 : vector<1x1x8x32xbf16> to vector<8x32xbf16>
    %cst_40 = arith.constant dense<0.000000e+00> : vector<8x128xf32>
    %85 = tpu.matmul %84, %4, %cst_40 {dimension_numbers = #tpu.dot_dimension_numbers<[1], [0], [0], [1], [0, 0, 1, 1], [], []>} : vector<8x32xbf16>, vector<32x128xbf16>, vector<8x128xf32> -> vector<8x128xf32>
    %86 = vector.broadcast %8 : vector<1x128xf32> to vector<8x128xf32>
    %87 = arith.addf %85, %86 : vector<8x128xf32>
    %88 = arith.truncf %79 : vector<8x32xf32> to vector<8x32xbf16>
    %cst_41 = arith.constant dense<0.000000e+00> : vector<8x128xf32>
    %89 = tpu.matmul %88, %6, %cst_41 {dimension_numbers = #tpu.dot_dimension_numbers<[1], [0], [0], [1], [0, 0, 1, 1], [], []>} : vector<8x32xbf16>, vector<32x128xbf16>, vector<8x128xf32> -> vector<8x128xf32>
    %90 = arith.addf %87, %89 : vector<8x128xf32>
    %91 = vector.extract_strided_slice %90 {offsets = [0, 0], sizes = [8, 32], strides = [1, 1]} : vector<8x128xf32> to vector<8x32xf32>
    %92 = arith.negf %91 : vector<8x32xf32>
    %93 = math.exp %92 : vector<8x32xf32>
    %cst_42 = arith.constant 1.000000e+00 : f32
    %94 = vector.broadcast %cst_42 : f32 to vector<8x32xf32>
    %95 = arith.addf %94, %93 : vector<8x32xf32>
    %96 = arith.divf %94, %95 : vector<8x32xf32>
    %97 = vector.extract_strided_slice %90 {offsets = [0, 32], sizes = [8, 32], strides = [1, 1]} : vector<8x128xf32> to vector<8x32xf32>
    %98 = arith.negf %97 : vector<8x32xf32>
    %99 = math.exp %98 : vector<8x32xf32>
    %cst_43 = arith.constant 1.000000e+00 : f32
    %100 = vector.broadcast %cst_43 : f32 to vector<8x32xf32>
    %101 = arith.addf %100, %99 : vector<8x32xf32>
    %102 = arith.divf %100, %101 : vector<8x32xf32>
    %103 = vector.extract_strided_slice %90 {offsets = [0, 64], sizes = [8, 32], strides = [1, 1]} : vector<8x128xf32> to vector<8x32xf32>
    %104 = math.tanh %103 : vector<8x32xf32>
    %105 = vector.extract_strided_slice %90 {offsets = [0, 96], sizes = [8, 32], strides = [1, 1]} : vector<8x128xf32> to vector<8x32xf32>
    %106 = arith.negf %105 : vector<8x32xf32>
    %107 = math.exp %106 : vector<8x32xf32>
    %cst_44 = arith.constant 1.000000e+00 : f32
    %108 = vector.broadcast %cst_44 : f32 to vector<8x32xf32>
    %109 = arith.addf %108, %107 : vector<8x32xf32>
    %110 = arith.divf %108, %109 : vector<8x32xf32>
    %111 = arith.mulf %102, %77 : vector<8x32xf32>
    %112 = arith.mulf %96, %104 : vector<8x32xf32>
    %113 = arith.addf %111, %112 : vector<8x32xf32>
    %114 = math.tanh %113 : vector<8x32xf32>
    %115 = arith.mulf %110, %114 : vector<8x32xf32>
    %c0_45 = arith.constant 0 : index
    %c2_46 = arith.constant 2 : index
    %c0_47 = arith.constant 0 : index
    %c0_48 = arith.constant 0 : index
    %116 = vector.load %arg6[%c0_45, %c2_46, %c0_47, %c0_48] : memref<1x8x8x32xf32, #tpu.memory_space<vmem>>, vector<1x1x8x32xf32>
    %117 = vector.shape_cast %116 : vector<1x1x8x32xf32> to vector<8x32xf32>
    %118 = vector.shape_cast %115 : vector<8x32xf32> to vector<1x1x8x32xf32>
    tpu.vector_store %arg6[%c0_45, %c2_46, %c0_47, %c0_48], %118 {strides = array<i32>} : memref<1x8x8x32xf32, #tpu.memory_space<vmem>>, vector<1x1x8x32xf32>,
    %c0_49 = arith.constant 0 : index
    %c3 = arith.constant 3 : index
    %c0_50 = arith.constant 0 : index
    %c0_51 = arith.constant 0 : index
    %119 = vector.load %arg2[%c0_49, %c3, %c0_50, %c0_51] : memref<1x8x8x32xbf16, #tpu.memory_space<vmem>>, vector<1x1x8x32xbf16>
    %120 = vector.shape_cast %119 : vector<1x1x8x32xbf16> to vector<8x32xbf16>
    %cst_52 = arith.constant dense<0.000000e+00> : vector<8x128xf32>
    %121 = tpu.matmul %120, %4, %cst_52 {dimension_numbers = #tpu.dot_dimension_numbers<[1], [0], [0], [1], [0, 0, 1, 1], [], []>} : vector<8x32xbf16>, vector<32x128xbf16>, vector<8x128xf32> -> vector<8x128xf32>
    %122 = vector.broadcast %8 : vector<1x128xf32> to vector<8x128xf32>
    %123 = arith.addf %121, %122 : vector<8x128xf32>
    %124 = arith.truncf %115 : vector<8x32xf32> to vector<8x32xbf16>
    %cst_53 = arith.constant dense<0.000000e+00> : vector<8x128xf32>
    %125 = tpu.matmul %124, %6, %cst_53 {dimension_numbers = #tpu.dot_dimension_numbers<[1], [0], [0], [1], [0, 0, 1, 1], [], []>} : vector<8x32xbf16>, vector<32x128xbf16>, vector<8x128xf32> -> vector<8x128xf32>
    %126 = arith.addf %123, %125 : vector<8x128xf32>
    %127 = vector.extract_strided_slice %126 {offsets = [0, 0], sizes = [8, 32], strides = [1, 1]} : vector<8x128xf32> to vector<8x32xf32>
    %128 = arith.negf %127 : vector<8x32xf32>
    %129 = math.exp %128 : vector<8x32xf32>
    %cst_54 = arith.constant 1.000000e+00 : f32
    %130 = vector.broadcast %cst_54 : f32 to vector<8x32xf32>
    %131 = arith.addf %130, %129 : vector<8x32xf32>
    %132 = arith.divf %130, %131 : vector<8x32xf32>
    %133 = vector.extract_strided_slice %126 {offsets = [0, 32], sizes = [8, 32], strides = [1, 1]} : vector<8x128xf32> to vector<8x32xf32>
    %134 = arith.negf %133 : vector<8x32xf32>
    %135 = math.exp %134 : vector<8x32xf32>
    %cst_55 = arith.constant 1.000000e+00 : f32
    %136 = vector.broadcast %cst_55 : f32 to vector<8x32xf32>
    %137 = arith.addf %136, %135 : vector<8x32xf32>
    %138 = arith.divf %136, %137 : vector<8x32xf32>
    %139 = vector.extract_strided_slice %126 {offsets = [0, 64], sizes = [8, 32], strides = [1, 1]} : vector<8x128xf32> to vector<8x32xf32>
    %140 = math.tanh %139 : vector<8x32xf32>
    %141 = vector.extract_strided_slice %126 {offsets = [0, 96], sizes = [8, 32], strides = [1, 1]} : vector<8x128xf32> to vector<8x32xf32>
    %142 = arith.negf %141 : vector<8x32xf32>
    %143 = math.exp %142 : vector<8x32xf32>
    %cst_56 = arith.constant 1.000000e+00 : f32
    %144 = vector.broadcast %cst_56 : f32 to vector<8x32xf32>
    %145 = arith.addf %144, %143 : vector<8x32xf32>
    %146 = arith.divf %144, %145 : vector<8x32xf32>
    %147 = arith.mulf %138, %113 : vector<8x32xf32>
    %148 = arith.mulf %132, %140 : vector<8x32xf32>
    %149 = arith.addf %147, %148 : vector<8x32xf32>
    %150 = math.tanh %149 : vector<8x32xf32>
    %151 = arith.mulf %146, %150 : vector<8x32xf32>
    %c0_57 = arith.constant 0 : index
    %c3_58 = arith.constant 3 : index
    %c0_59 = arith.constant 0 : index
    %c0_60 = arith.constant 0 : index
    %152 = vector.load %arg6[%c0_57, %c3_58, %c0_59, %c0_60] : memref<1x8x8x32xf32, #tpu.memory_space<vmem>>, vector<1x1x8x32xf32>
    %153 = vector.shape_cast %152 : vector<1x1x8x32xf32> to vector<8x32xf32>
    %154 = vector.shape_cast %151 : vector<8x32xf32> to vector<1x1x8x32xf32>
    tpu.vector_store %arg6[%c0_57, %c3_58, %c0_59, %c0_60], %154 {strides = array<i32>} : memref<1x8x8x32xf32, #tpu.memory_space<vmem>>, vector<1x1x8x32xf32>,
    %c0_61 = arith.constant 0 : index
    %c4 = arith.constant 4 : index
    %c0_62 = arith.constant 0 : index
    %c0_63 = arith.constant 0 : index
    %155 = vector.load %arg2[%c0_61, %c4, %c0_62, %c0_63] : memref<1x8x8x32xbf16, #tpu.memory_space<vmem>>, vector<1x1x8x32xbf16>
    %156 = vector.shape_cast %155 : vector<1x1x8x32xbf16> to vector<8x32xbf16>
    %cst_64 = arith.constant dense<0.000000e+00> : vector<8x128xf32>
    %157 = tpu.matmul %156, %4, %cst_64 {dimension_numbers = #tpu.dot_dimension_numbers<[1], [0], [0], [1], [0, 0, 1, 1], [], []>} : vector<8x32xbf16>, vector<32x128xbf16>, vector<8x128xf32> -> vector<8x128xf32>
    %158 = vector.broadcast %8 : vector<1x128xf32> to vector<8x128xf32>
    %159 = arith.addf %157, %158 : vector<8x128xf32>
    %160 = arith.truncf %151 : vector<8x32xf32> to vector<8x32xbf16>
    %cst_65 = arith.constant dense<0.000000e+00> : vector<8x128xf32>
    %161 = tpu.matmul %160, %6, %cst_65 {dimension_numbers = #tpu.dot_dimension_numbers<[1], [0], [0], [1], [0, 0, 1, 1], [], []>} : vector<8x32xbf16>, vector<32x128xbf16>, vector<8x128xf32> -> vector<8x128xf32>
    %162 = arith.addf %159, %161 : vector<8x128xf32>
    %163 = vector.extract_strided_slice %162 {offsets = [0, 0], sizes = [8, 32], strides = [1, 1]} : vector<8x128xf32> to vector<8x32xf32>
    %164 = arith.negf %163 : vector<8x32xf32>
    %165 = math.exp %164 : vector<8x32xf32>
    %cst_66 = arith.constant 1.000000e+00 : f32
    %166 = vector.broadcast %cst_66 : f32 to vector<8x32xf32>
    %167 = arith.addf %166, %165 : vector<8x32xf32>
    %168 = arith.divf %166, %167 : vector<8x32xf32>
    %169 = vector.extract_strided_slice %162 {offsets = [0, 32], sizes = [8, 32], strides = [1, 1]} : vector<8x128xf32> to vector<8x32xf32>
    %170 = arith.negf %169 : vector<8x32xf32>
    %171 = math.exp %170 : vector<8x32xf32>
    %cst_67 = arith.constant 1.000000e+00 : f32
    %172 = vector.broadcast %cst_67 : f32 to vector<8x32xf32>
    %173 = arith.addf %172, %171 : vector<8x32xf32>
    %174 = arith.divf %172, %173 : vector<8x32xf32>
    %175 = vector.extract_strided_slice %162 {offsets = [0, 64], sizes = [8, 32], strides = [1, 1]} : vector<8x128xf32> to vector<8x32xf32>
    %176 = math.tanh %175 : vector<8x32xf32>
    %177 = vector.extract_strided_slice %162 {offsets = [0, 96], sizes = [8, 32], strides = [1, 1]} : vector<8x128xf32> to vector<8x32xf32>
    %178 = arith.negf %177 : vector<8x32xf32>
    %179 = math.exp %178 : vector<8x32xf32>
    %cst_68 = arith.constant 1.000000e+00 : f32
    %180 = vector.broadcast %cst_68 : f32 to vector<8x32xf32>
    %181 = arith.addf %180, %179 : vector<8x32xf32>
    %182 = arith.divf %180, %181 : vector<8x32xf32>
    %183 = arith.mulf %174, %149 : vector<8x32xf32>
    %184 = arith.mulf %168, %176 : vector<8x32xf32>
    %185 = arith.addf %183, %184 : vector<8x32xf32>
    %186 = math.tanh %185 : vector<8x32xf32>
    %187 = arith.mulf %182, %186 : vector<8x32xf32>
    %c0_69 = arith.constant 0 : index
    %c4_70 = arith.constant 4 : index
    %c0_71 = arith.constant 0 : index
    %c0_72 = arith.constant 0 : index
    %188 = vector.load %arg6[%c0_69, %c4_70, %c0_71, %c0_72] : memref<1x8x8x32xf32, #tpu.memory_space<vmem>>, vector<1x1x8x32xf32>
    %189 = vector.shape_cast %188 : vector<1x1x8x32xf32> to vector<8x32xf32>
    %190 = vector.shape_cast %187 : vector<8x32xf32> to vector<1x1x8x32xf32>
    tpu.vector_store %arg6[%c0_69, %c4_70, %c0_71, %c0_72], %190 {strides = array<i32>} : memref<1x8x8x32xf32, #tpu.memory_space<vmem>>, vector<1x1x8x32xf32>,
    %c0_73 = arith.constant 0 : index
    %c5 = arith.constant 5 : index
    %c0_74 = arith.constant 0 : index
    %c0_75 = arith.constant 0 : index
    %191 = vector.load %arg2[%c0_73, %c5, %c0_74, %c0_75] : memref<1x8x8x32xbf16, #tpu.memory_space<vmem>>, vector<1x1x8x32xbf16>
    %192 = vector.shape_cast %191 : vector<1x1x8x32xbf16> to vector<8x32xbf16>
    %cst_76 = arith.constant dense<0.000000e+00> : vector<8x128xf32>
    %193 = tpu.matmul %192, %4, %cst_76 {dimension_numbers = #tpu.dot_dimension_numbers<[1], [0], [0], [1], [0, 0, 1, 1], [], []>} : vector<8x32xbf16>, vector<32x128xbf16>, vector<8x128xf32> -> vector<8x128xf32>
    %194 = vector.broadcast %8 : vector<1x128xf32> to vector<8x128xf32>
    %195 = arith.addf %193, %194 : vector<8x128xf32>
    %196 = arith.truncf %187 : vector<8x32xf32> to vector<8x32xbf16>
    %cst_77 = arith.constant dense<0.000000e+00> : vector<8x128xf32>
    %197 = tpu.matmul %196, %6, %cst_77 {dimension_numbers = #tpu.dot_dimension_numbers<[1], [0], [0], [1], [0, 0, 1, 1], [], []>} : vector<8x32xbf16>, vector<32x128xbf16>, vector<8x128xf32> -> vector<8x128xf32>
    %198 = arith.addf %195, %197 : vector<8x128xf32>
    %199 = vector.extract_strided_slice %198 {offsets = [0, 0], sizes = [8, 32], strides = [1, 1]} : vector<8x128xf32> to vector<8x32xf32>
    %200 = arith.negf %199 : vector<8x32xf32>
    %201 = math.exp %200 : vector<8x32xf32>
    %cst_78 = arith.constant 1.000000e+00 : f32
    %202 = vector.broadcast %cst_78 : f32 to vector<8x32xf32>
    %203 = arith.addf %202, %201 : vector<8x32xf32>
    %204 = arith.divf %202, %203 : vector<8x32xf32>
    %205 = vector.extract_strided_slice %198 {offsets = [0, 32], sizes = [8, 32], strides = [1, 1]} : vector<8x128xf32> to vector<8x32xf32>
    %206 = arith.negf %205 : vector<8x32xf32>
    %207 = math.exp %206 : vector<8x32xf32>
    %cst_79 = arith.constant 1.000000e+00 : f32
    %208 = vector.broadcast %cst_79 : f32 to vector<8x32xf32>
    %209 = arith.addf %208, %207 : vector<8x32xf32>
    %210 = arith.divf %208, %209 : vector<8x32xf32>
    %211 = vector.extract_strided_slice %198 {offsets = [0, 64], sizes = [8, 32], strides = [1, 1]} : vector<8x128xf32> to vector<8x32xf32>
    %212 = math.tanh %211 : vector<8x32xf32>
    %213 = vector.extract_strided_slice %198 {offsets = [0, 96], sizes = [8, 32], strides = [1, 1]} : vector<8x128xf32> to vector<8x32xf32>
    %214 = arith.negf %213 : vector<8x32xf32>
    %215 = math.exp %214 : vector<8x32xf32>
    %cst_80 = arith.constant 1.000000e+00 : f32
    %216 = vector.broadcast %cst_80 : f32 to vector<8x32xf32>
    %217 = arith.addf %216, %215 : vector<8x32xf32>
    %218 = arith.divf %216, %217 : vector<8x32xf32>
    %219 = arith.mulf %210, %185 : vector<8x32xf32>
    %220 = arith.mulf %204, %212 : vector<8x32xf32>
    %221 = arith.addf %219, %220 : vector<8x32xf32>
    %222 = math.tanh %221 : vector<8x32xf32>
    %223 = arith.mulf %218, %222 : vector<8x32xf32>
    %c0_81 = arith.constant 0 : index
    %c5_82 = arith.constant 5 : index
    %c0_83 = arith.constant 0 : index
    %c0_84 = arith.constant 0 : index
    %224 = vector.load %arg6[%c0_81, %c5_82, %c0_83, %c0_84] : memref<1x8x8x32xf32, #tpu.memory_space<vmem>>, vector<1x1x8x32xf32>
    %225 = vector.shape_cast %224 : vector<1x1x8x32xf32> to vector<8x32xf32>
    %226 = vector.shape_cast %223 : vector<8x32xf32> to vector<1x1x8x32xf32>
    tpu.vector_store %arg6[%c0_81, %c5_82, %c0_83, %c0_84], %226 {strides = array<i32>} : memref<1x8x8x32xf32, #tpu.memory_space<vmem>>, vector<1x1x8x32xf32>,
    %c0_85 = arith.constant 0 : index
    %c6 = arith.constant 6 : index
    %c0_86 = arith.constant 0 : index
    %c0_87 = arith.constant 0 : index
    %227 = vector.load %arg2[%c0_85, %c6, %c0_86, %c0_87] : memref<1x8x8x32xbf16, #tpu.memory_space<vmem>>, vector<1x1x8x32xbf16>
    %228 = vector.shape_cast %227 : vector<1x1x8x32xbf16> to vector<8x32xbf16>
    %cst_88 = arith.constant dense<0.000000e+00> : vector<8x128xf32>
    %229 = tpu.matmul %228, %4, %cst_88 {dimension_numbers = #tpu.dot_dimension_numbers<[1], [0], [0], [1], [0, 0, 1, 1], [], []>} : vector<8x32xbf16>, vector<32x128xbf16>, vector<8x128xf32> -> vector<8x128xf32>
    %230 = vector.broadcast %8 : vector<1x128xf32> to vector<8x128xf32>
    %231 = arith.addf %229, %230 : vector<8x128xf32>
    %232 = arith.truncf %223 : vector<8x32xf32> to vector<8x32xbf16>
    %cst_89 = arith.constant dense<0.000000e+00> : vector<8x128xf32>
    %233 = tpu.matmul %232, %6, %cst_89 {dimension_numbers = #tpu.dot_dimension_numbers<[1], [0], [0], [1], [0, 0, 1, 1], [], []>} : vector<8x32xbf16>, vector<32x128xbf16>, vector<8x128xf32> -> vector<8x128xf32>
    %234 = arith.addf %231, %233 : vector<8x128xf32>
    %235 = vector.extract_strided_slice %234 {offsets = [0, 0], sizes = [8, 32], strides = [1, 1]} : vector<8x128xf32> to vector<8x32xf32>
    %236 = arith.negf %235 : vector<8x32xf32>
    %237 = math.exp %236 : vector<8x32xf32>
    %cst_90 = arith.constant 1.000000e+00 : f32
    %238 = vector.broadcast %cst_90 : f32 to vector<8x32xf32>
    %239 = arith.addf %238, %237 : vector<8x32xf32>
    %240 = arith.divf %238, %239 : vector<8x32xf32>
    %241 = vector.extract_strided_slice %234 {offsets = [0, 32], sizes = [8, 32], strides = [1, 1]} : vector<8x128xf32> to vector<8x32xf32>
    %242 = arith.negf %241 : vector<8x32xf32>
    %243 = math.exp %242 : vector<8x32xf32>
    %cst_91 = arith.constant 1.000000e+00 : f32
    %244 = vector.broadcast %cst_91 : f32 to vector<8x32xf32>
    %245 = arith.addf %244, %243 : vector<8x32xf32>
    %246 = arith.divf %244, %245 : vector<8x32xf32>
    %247 = vector.extract_strided_slice %234 {offsets = [0, 64], sizes = [8, 32], strides = [1, 1]} : vector<8x128xf32> to vector<8x32xf32>
    %248 = math.tanh %247 : vector<8x32xf32>
    %249 = vector.extract_strided_slice %234 {offsets = [0, 96], sizes = [8, 32], strides = [1, 1]} : vector<8x128xf32> to vector<8x32xf32>
    %250 = arith.negf %249 : vector<8x32xf32>
    %251 = math.exp %250 : vector<8x32xf32>
    %cst_92 = arith.constant 1.000000e+00 : f32
    %252 = vector.broadcast %cst_92 : f32 to vector<8x32xf32>
    %253 = arith.addf %252, %251 : vector<8x32xf32>
    %254 = arith.divf %252, %253 : vector<8x32xf32>
    %255 = arith.mulf %246, %221 : vector<8x32xf32>
    %256 = arith.mulf %240, %248 : vector<8x32xf32>
    %257 = arith.addf %255, %256 : vector<8x32xf32>
    %258 = math.tanh %257 : vector<8x32xf32>
    %259 = arith.mulf %254, %258 : vector<8x32xf32>
    %c0_93 = arith.constant 0 : index
    %c6_94 = arith.constant 6 : index
    %c0_95 = arith.constant 0 : index
    %c0_96 = arith.constant 0 : index
    %260 = vector.load %arg6[%c0_93, %c6_94, %c0_95, %c0_96] : memref<1x8x8x32xf32, #tpu.memory_space<vmem>>, vector<1x1x8x32xf32>
    %261 = vector.shape_cast %260 : vector<1x1x8x32xf32> to vector<8x32xf32>
    %262 = vector.shape_cast %259 : vector<8x32xf32> to vector<1x1x8x32xf32>
    tpu.vector_store %arg6[%c0_93, %c6_94, %c0_95, %c0_96], %262 {strides = array<i32>} : memref<1x8x8x32xf32, #tpu.memory_space<vmem>>, vector<1x1x8x32xf32>,
    %c0_97 = arith.constant 0 : index
    %c7 = arith.constant 7 : index
    %c0_98 = arith.constant 0 : index
    %c0_99 = arith.constant 0 : index
    %263 = vector.load %arg2[%c0_97, %c7, %c0_98, %c0_99] : memref<1x8x8x32xbf16, #tpu.memory_space<vmem>>, vector<1x1x8x32xbf16>
    %264 = vector.shape_cast %263 : vector<1x1x8x32xbf16> to vector<8x32xbf16>
    %cst_100 = arith.constant dense<0.000000e+00> : vector<8x128xf32>
    %265 = tpu.matmul %264, %4, %cst_100 {dimension_numbers = #tpu.dot_dimension_numbers<[1], [0], [0], [1], [0, 0, 1, 1], [], []>} : vector<8x32xbf16>, vector<32x128xbf16>, vector<8x128xf32> -> vector<8x128xf32>
    %266 = vector.broadcast %8 : vector<1x128xf32> to vector<8x128xf32>
    %267 = arith.addf %265, %266 : vector<8x128xf32>
    %268 = arith.truncf %259 : vector<8x32xf32> to vector<8x32xbf16>
    %cst_101 = arith.constant dense<0.000000e+00> : vector<8x128xf32>
    %269 = tpu.matmul %268, %6, %cst_101 {dimension_numbers = #tpu.dot_dimension_numbers<[1], [0], [0], [1], [0, 0, 1, 1], [], []>} : vector<8x32xbf16>, vector<32x128xbf16>, vector<8x128xf32> -> vector<8x128xf32>
    %270 = arith.addf %267, %269 : vector<8x128xf32>
    %271 = vector.extract_strided_slice %270 {offsets = [0, 0], sizes = [8, 32], strides = [1, 1]} : vector<8x128xf32> to vector<8x32xf32>
    %272 = arith.negf %271 : vector<8x32xf32>
    %273 = math.exp %272 : vector<8x32xf32>
    %cst_102 = arith.constant 1.000000e+00 : f32
    %274 = vector.broadcast %cst_102 : f32 to vector<8x32xf32>
    %275 = arith.addf %274, %273 : vector<8x32xf32>
    %276 = arith.divf %274, %275 : vector<8x32xf32>
    %277 = vector.extract_strided_slice %270 {offsets = [0, 32], sizes = [8, 32], strides = [1, 1]} : vector<8x128xf32> to vector<8x32xf32>
    %278 = arith.negf %277 : vector<8x32xf32>
    %279 = math.exp %278 : vector<8x32xf32>
    %cst_103 = arith.constant 1.000000e+00 : f32
    %280 = vector.broadcast %cst_103 : f32 to vector<8x32xf32>
    %281 = arith.addf %280, %279 : vector<8x32xf32>
    %282 = arith.divf %280, %281 : vector<8x32xf32>
    %283 = vector.extract_strided_slice %270 {offsets = [0, 64], sizes = [8, 32], strides = [1, 1]} : vector<8x128xf32> to vector<8x32xf32>
    %284 = math.tanh %283 : vector<8x32xf32>
    %285 = vector.extract_strided_slice %270 {offsets = [0, 96], sizes = [8, 32], strides = [1, 1]} : vector<8x128xf32> to vector<8x32xf32>
    %286 = arith.negf %285 : vector<8x32xf32>
    %287 = math.exp %286 : vector<8x32xf32>
    %cst_104 = arith.constant 1.000000e+00 : f32
    %288 = vector.broadcast %cst_104 : f32 to vector<8x32xf32>
    %289 = arith.addf %288, %287 : vector<8x32xf32>
    %290 = arith.divf %288, %289 : vector<8x32xf32>
    %291 = arith.mulf %282, %257 : vector<8x32xf32>
    %292 = arith.mulf %276, %284 : vector<8x32xf32>
    %293 = arith.addf %291, %292 : vector<8x32xf32>
    %294 = math.tanh %293 : vector<8x32xf32>
    %295 = arith.mulf %290, %294 : vector<8x32xf32>
    %c0_105 = arith.constant 0 : index
    %c7_106 = arith.constant 7 : index
    %c0_107 = arith.constant 0 : index
    %c0_108 = arith.constant 0 : index
    %296 = vector.load %arg6[%c0_105, %c7_106, %c0_107, %c0_108] : memref<1x8x8x32xf32, #tpu.memory_space<vmem>>, vector<1x1x8x32xf32>
    %297 = vector.shape_cast %296 : vector<1x1x8x32xf32> to vector<8x32xf32>
    %298 = vector.shape_cast %295 : vector<8x32xf32> to vector<1x1x8x32xf32>
    tpu.vector_store %arg6[%c0_105, %c7_106, %c0_107, %c0_108], %298 {strides = array<i32>} : memref<1x8x8x32xf32, #tpu.memory_space<vmem>>, vector<1x1x8x32xf32>,
    %c0_109 = arith.constant 0 : index
    %c0_110 = arith.constant 0 : index
    %299 = vector.load %arg9[%c0_109, %c0_110] : memref<8x32xf32, #tpu.memory_space<vmem>>, vector<8x32xf32>
    tpu.vector_store %arg9[%c0_109, %c0_110], %295 {strides = array<i32>} : memref<8x32xf32, #tpu.memory_space<vmem>>, vector<8x32xf32>,
    %c0_111 = arith.constant 0 : index
    %c0_112 = arith.constant 0 : index
    %300 = vector.load %arg10[%c0_111, %c0_112] : memref<8x32xf32, #tpu.memory_space<vmem>>, vector<8x32xf32>
    tpu.vector_store %arg10[%c0_111, %c0_112], %293 {strides = array<i32>} : memref<8x32xf32, #tpu.memory_space<vmem>>, vector<8x32xf32>,
    %c0_113 = arith.constant 0 : index
    %c0_114 = arith.constant 0 : index
    %c0_115 = arith.constant 0 : index
    %301 = vector.load %arg7[%c0_113, %c0_114, %c0_115] : memref<1x8x32xf32, #tpu.memory_space<vmem>>, vector<1x8x32xf32>
    %302 = vector.shape_cast %301 : vector<1x8x32xf32> to vector<8x32xf32>
    %303 = vector.shape_cast %295 : vector<8x32xf32> to vector<1x8x32xf32>
    tpu.vector_store %arg7[%c0_113, %c0_114, %c0_115], %303 {strides = array<i32>} : memref<1x8x32xf32, #tpu.memory_space<vmem>>, vector<1x8x32xf32>,
    %c0_116 = arith.constant 0 : index
    %c0_117 = arith.constant 0 : index
    %c0_118 = arith.constant 0 : index
    %304 = vector.load %arg8[%c0_116, %c0_117, %c0_118] : memref<1x8x32xf32, #tpu.memory_space<vmem>>, vector<1x8x32xf32>
    %305 = vector.shape_cast %304 : vector<1x8x32xf32> to vector<8x32xf32>
    %306 = vector.shape_cast %293 : vector<8x32xf32> to vector<1x8x32xf32>
    tpu.vector_store %arg8[%c0_116, %c0_117, %c0_118], %306 {strides = array<i32>} : memref<1x8x32xf32, #tpu.memory_space<vmem>>, vector<1x8x32xf32>,
    return
  }
  func.func @transform_0(%arg0: i32, %arg1: i32) -> (i32, i32, i32, i32) {
    %c0_i32 = arith.constant 0 : i32
    %c0_i32_0 = arith.constant 0 : i32
    %c0_i32_1 = arith.constant 0 : i32
    return %arg0, %arg1, %c0_i32, %c0_i32_0 : i32, i32, i32, i32
  }
  func.func @transform_1(%arg0: i32, %arg1: i32) -> (i32, i32, i32) {
    %c0_i32 = arith.constant 0 : i32
    %c0_i32_0 = arith.constant 0 : i32
    %c0_i32_1 = arith.constant 0 : i32
    return %arg0, %c0_i32, %c0_i32_0 : i32, i32, i32
  }
  func.func @transform_2(%arg0: i32, %arg1: i32) -> (i32, i32, i32) {
    %c0_i32 = arith.constant 0 : i32
    %c0_i32_0 = arith.constant 0 : i32
    %c0_i32_1 = arith.constant 0 : i32
    return %arg0, %c0_i32, %c0_i32_0 : i32, i32, i32
  }
  func.func @transform_3(%arg0: i32, %arg1: i32) -> (i32, i32, i32) {
    %c0_i32 = arith.constant 0 : i32
    %c0_i32_0 = arith.constant 0 : i32
    %c0_i32_1 = arith.constant 0 : i32
    return %arg0, %c0_i32, %c0_i32_0 : i32, i32, i32
  }
  func.func @transform_4(%arg0: i32, %arg1: i32) -> (i32, i32, i32, i32) {
    %c0_i32 = arith.constant 0 : i32
    %c0_i32_0 = arith.constant 0 : i32
    %c0_i32_1 = arith.constant 0 : i32
    return %arg0, %arg1, %c0_i32, %c0_i32_0 : i32, i32, i32, i32
  }
  func.func @transform_5(%arg0: i32, %arg1: i32) -> (i32, i32, i32) {
    %c0_i32 = arith.constant 0 : i32
    %c0_i32_0 = arith.constant 0 : i32
    %c0_i32_1 = arith.constant 0 : i32
    return %arg0, %c0_i32, %c0_i32_0 : i32, i32, i32
  }
  func.func @transform_6(%arg0: i32, %arg1: i32) -> (i32, i32, i32) {
    %c0_i32 = arith.constant 0 : i32
    %c0_i32_0 = arith.constant 0 : i32
    %c0_i32_1 = arith.constant 0 : i32
    return %arg0, %c0_i32, %c0_i32_0 : i32, i32, i32
  }
}

</mosaic_0001>

<bundles_post_ra>
// kernel: tpu_custom_call.1
= control target key start
LH: loop header
LB: loop body
LE: loop exit
PB: predicated region body
PF: predicated region fallthrough
CT: control target
= control target key end

     0   :  { %s2385_s0 = inlined_call_operand.hbm [shape: bf16[2,8,8,32], index: 0, kind: input, shape index: {}]   ;;  %s2386_s1 = inlined_call_operand.hbm [shape: bf16[2,32,128], index: 1, kind: input, shape index: {}]   ;;  %s2387_s2 = inlined_call_operand.hbm [shape: f32[2,1,128], index: 2, kind: input, shape index: {}]   ;;  %s2388_s3 = inlined_call_operand.hbm [shape: bf16[2,32,128], index: 3, kind: input, shape index: {}]   ;;  %s2389_s4 = inlined_call_operand.hbm [shape: f32[2,8,8,32], index: 4, kind: output, shape index: {0}]   ;;  %s2390_s5 = inlined_call_operand.hbm [shape: f32[2,8,32], index: 5, kind: output, shape index: {1}]   ;;  %s2391_s6 = inlined_call_operand.hbm [shape: f32[2,8,32], index: 6, kind: output, shape index: {2}]  }
   0x1   :  { %2405 = sst [smem:[#allocation28_spill]] %s2385_s0 }
   0x2   :  { %2406 = sst [smem:[#allocation29_spill]] %s2386_s1 }
   0x3   :  { %2407 = sst [smem:[#allocation30_spill]] %s2389_s4 }
   0x4   :  { %12 = vsyncpa [#allocation5], 0 }
   0x5   :  { %14 = vsyncpa [#allocation5 + $0x1], 0 }
   0x6   :  { %15 = vsyncpa [#allocation8], 0 }
   0x7   :  { %17 = vsyncpa [#allocation8 + $0x1], 0 }
   0x8   :  { %18 = vsyncpa [#allocation11], 0 }
   0x9   :  { %20 = vsyncpa [#allocation11 + $0x1], 0 }
   0xa   :  { %21 = vsyncpa [#allocation6], 0 }
   0xb   :  { %23 = vsyncpa [#allocation6 + $0x1], 0 }
   0xc   :  { %24 = vsyncpa [#allocation14], 0 }
   0xd   :  { %26 = vsyncpa [#allocation14 + $0x1], 0  ;;  %s1970_s21 = smov 0   ;;  %s1972_s22 = smov 0  }
   0xe   :  { %s1974_s23 = smov 0   ;;  %s1976_s24 = smov 0  }
   0xf   :  { %s1978_s25 = smov 0   ;;  %s1980_s26 = smov 0  }
  0x10 LB: > { %2408 = sst [smem:[#allocation21_spill]] %s1905_s21  ;;  %s2001_s27 = sadd.s32 4294967295, %s1925_s26   ;;  %s1925_s26 = sphi %s1980_s26, %s32_s26   ;;  %s1921_s25 = sphi %s1978_s25, %s2438_s25   ;;  %s1917_s24 = sphi %s1976_s24, %s2437_s24   ;;  %s1913_s23 = sphi %s1974_s23, %s2433_s23   ;;  %s1909_s22 = sphi %s1972_s22, %s2436_s22   ;;  %s1905_s21 = sphi %s1970_s21, %s2435_s21  }
  0x11   : > { %2409 = sst [smem:[#allocation22_spill]] %s1913_s23  ;;  %s2392_s28 = sadd.s32 4294967294, %s1925_s26  }
  0x12   : > { %2410 = sst [smem:[#allocation23_spill]] %s1925_s26  ;;  %s44_s29 = sadd.s32 1, %s1921_s25 }
  0x13   : > { %s53_s30 = sadd.s32 1, %s1913_s23  ;;  %p46_p0 = scmp.ge.s32.totalorder %s44_s29, 2 }
  0x14   : > { %p60_p1 = scmp.ne.s32.totalorder %s1913_s23, %s1909_s22  ;;  %p61_p2 = scmp.eq.s32.totalorder %s1925_s26, 0 }
  0x15   : > { %p66_p3 = scmp.ne.s32.totalorder %s1909_s22, %s1905_s21  ;;  %s2440_s29 = smov (%p46_p0, %s44_s29), 0 }
  0x16   : > { %2411 = sst [smem:[#allocation24_spill]] %s2440_s29  ;;  %p2013_p4 = por %p61_p2, %p60_p1 }
  0x17   : > { %p67_p5 = scmp.eq.s32.totalorder %s2001_s27, 0  ;;  %s48_s8 = ssub.s32 %s1921_s25, %s2440_s29 }
  0x18   : > { %p170_p6 = scmp.eq.s32.totalorder %s2001_s27, 1  ;;  %p51_p7 = scmp.eq.s32.totalorder %s48_s8, 0 }
  0x19   : > { %p2021_p8 = por %p67_p5, %p66_p3  ;;  %p176_p10 = scmp.eq.s32.totalorder %s2392_s28, 1 }
  0x1a   : > { %p2025_p9 = por %p170_p6, %p60_p1  ;;  %p1407_p12 = scmp.ge.s32.totalorder %s1925_s26, 2 }
  0x1b   : > { %s2032_s11 = scalar_select %p51_p7, %s1913_s23, %s53_s30  }
  0x1c   : > { %s2414_s10 = scalar_select %p2025_p9, 1, 0 }
  0x1d   : > { %2416 = sst [smem:[#allocation26_spill]] %s2032_s11  ;;  %p2034_p11 = por %p176_p10, %p66_p3 }
  0x1e   : > { %2415 = sst [smem:[#allocation25_spill]] %s2414_s10  ;;  %p1532_p13 = scmp.lt.s32.totalorder %s1925_s26, 2 }
  0x1f   : > { %s2417_s12 = scalar_select %p2034_p11, 1, 0 }
  0x20   : > { %s2041_s13 = sand.u32 1, %s1913_s23   ;;  %p2045_p0 = pnand %p1532_p13, %p2013_p4 }
  0x21   : > { %2418 = sst [smem:[#allocation27_spill]] %s2417_s12  ;;  %s272_s15 = sand.u32 1, %s1925_s26  }
  0x22   : > { %s2394_s16 = sshll.u32 %s2041_s13, 4  ;;  %s2395_s17 = sshll.u32 %s1921_s25, 4 }
  0x23   : > { %s276_s18 = scalar_lea.vmem [#allocation7], %s2394_s16  ;;  %s2420_s1 = sld [smem:[#allocation29_spill]] }
  0x24   : > { %s284_s19 = sshll.u32 %s276_s18, 4  ;;  %p1417_p1 = scmp.ge.s32.totalorder %s1925_s26, 1  ;;  %s285_s19 = int_to_ptr.vmem [resolvable:$true] %s284_s19 }
  0x25   : > { %p331_p2 = scmp.lt.s32.totalorder %s1925_s26, 3  ;;  %s273_s28 = scalar_lea.sflag [#allocation8], %s272_s15 }
  0x26   : > { %s1927_s29 = smov 64   ;;  %s1928_s11 = smov 4  }
  0x27   : > { %p2066_p3 = pnand %p1417_p1, %p331_p2  ;;  %s1408_s20 = sshll.u32 %s2041_s13, 5 }
  0x28   : > { %s1487_s30 = sshll.u32 %s1921_s25, 5  ;;  %s2422_s0 = sld [smem:[#allocation28_spill]] }
  0x29   : > { %s281_s7 = scalar_lea.hbm %s2420_s1, %s2395_s17  ;;  %s252_s1 = scalar_lea.vmem [#allocation4], %s1408_s20 }
  0x2a   : > { %s282_s8 = sshll.u32 %s281_s7, 4  ;;  %s262_s23 = sshll.u32 %s252_s1, 4  ;;  %s283_s8 = int_to_ptr.hbm [resolvable:$true] %s282_s8  ;;  %s263_s23 = int_to_ptr.vmem [resolvable:$true] %s262_s23 }
  0x2b   : > { %1515 = dma.hbm_to_vmem [thread:$0]  (!%p2045_p0), %s283_s8, 256, %s285_s19, %s273_s28, %s1927_s29, %s1927_s29, %s1928_s11  }
  0x2c   : > { %s249_s19 = scalar_lea.sflag [#allocation5], %s2041_s13  ;;  %s300_s16 = scalar_lea.hbm %s2387_s2, %s1921_s25 }
  0x2d   : > { %s302_s7 = sshll.u32 %s300_s16, 4  ;;  %s2423_s1 = sshll.u32 %s1921_s25, 4  ;;  %s303_s7 = int_to_ptr.hbm [resolvable:$true] %s302_s7 }
  0x2e   : > { %s259_s15 = scalar_lea.hbm %s2422_s0, %s1487_s30  ;;  %s297_s30 = scalar_lea.vmem [#allocation9], %s2041_s13 }
  0x2f   : > { %s260_s17 = sshll.u32 %s259_s15, 4  ;;  %s304_s0 = sshll.u32 %s297_s30, 4  ;;  %s261_s17 = int_to_ptr.hbm [resolvable:$true] %s260_s17  ;;  %s305_s0 = int_to_ptr.vmem [resolvable:$true] %s304_s0 }
  0x30   : > { %1512 = dma.hbm_to_vmem [thread:$0]  (!%p2045_p0), %s261_s17, 512, %s263_s23, %s249_s19, %s1927_s29, %s1927_s29, %s1928_s11  }
  0x31   : > { %1518 = dma.hbm_to_vmem [thread:$0]  (!%p2045_p0), %s303_s7, 16, %s305_s0, %s273_s28  }
  0x32   : > { %s320_s12 = scalar_lea.hbm %s2388_s3, %s2423_s1  ;;  %s2424_s21 = sshll.u32 %s2041_s13, 4 }
  0x33   : > { %s315_s10 = scalar_lea.vmem [#allocation10], %s2424_s21  ;;  %s321_s23 = sshll.u32 %s320_s12, 4  ;;  %s322_s23 = int_to_ptr.hbm [resolvable:$true] %s321_s23 }
  0x34   : > { %s323_s4 = sshll.u32 %s315_s10, 4  ;;  %s312_s26 = scalar_lea.sflag [#allocation11], %s2041_s13  ;;  %s324_s4 = int_to_ptr.vmem [resolvable:$true] %s323_s4 }
  0x35   : > { %1521 = dma.hbm_to_vmem [thread:$0]  (!%p2045_p0), %s322_s23, 256, %s324_s4, %s312_s26, %s1927_s29, %s1927_s29, %s1928_s11  }
  0x36   : > { %335 = sbr.rel (%p2066_p3) target bundleno = 4745 (0x1289), region = 36  ;;  %s2104_s0 = sand.u32 (!%p2066_p3), 1, %s1909_s22  }
  0x37   : > { %s1418_s21 = sshll.u32 (!%p2066_p3), %s2104_s0, 5  ;;  %s338_s28 = scalar_lea.sflag (!%p2066_p3), [#allocation5], %s2104_s0 }
  0x38   : > { %s2108_s10 = scalar_lea.vmem (!%p2066_p3), [#allocation4], %s1418_s21 }
  0x3b   : > { %1884 = dma.done.wait (%p2021_p8), %s338_s28, 512  }
  0x3c   : > { %1886 = vsyncadd (%p2021_p8), %s338_s28, 4294966784  ;;  %s2404_s4 = sand.u32 1, %s2001_s27   ;;  %s1419_s29 = sshll.u32 %s2104_s0, 4 }
  0x3d   : > { %s348_s11 = scalar_lea.sflag [#allocation8], %s2404_s4  ;;  %s351_s12 = scalar_lea.vmem [#allocation7], %s1419_s29 }
  0x3e   : > { %1888 = dma.done.wait (%p2021_p8), %s348_s11, 272  }
  0x3f   : > { %1890 = vsyncadd (%p2021_p8), %s348_s11, 4294967024  ;;  %s360_s13 = scalar_lea.vmem [#allocation9], %s2104_s0  ;;  %s367_s14 = scalar_lea.sflag [#allocation11], %s2104_s0 }
  0x40   : > { %s370_s17 = scalar_lea.vmem [#allocation10], %s1419_s29 }
  0x41   : > { %1892 = dma.done.wait (%p2021_p8), %s367_s14, 256  }
  0x42   : > { %1894 = vsyncadd (%p2021_p8), %s367_s14, 4294967040  ;;  %vm431_vm0 = vcmask 261120   ;;  %v1929_v0 = vmov 0.0   ;;  %v2130_v1 = vld [vmem:[%s351_s12 + $0x8] sm:$0xff]  ;;  %v2134_v3 = vld [vmem:[%s351_s12] sm:$0xff]  ;;  %s1930_s9 = smov 64  }
  0x43   : > { %432 = vst.msk [vmem:[#allocation2] sm:$0xff] %vm431_vm0, %v1929_v0  ;;  %v2132_v2 = vld [vmem:[%s370_s17 + $0x8] sm:$0xff]  ;;  %471 = vmatpush.bf16.msra.mxu0 %v2130_v1  ;;  %v2138_v4 = vld [vmem:[%s370_s17] sm:$0xff]  ;;  %565 = vmatpush.bf16.msra.mxu2 %v2130_v1  ;;  %s1931_s18 = smov 32   ;;  %s1421_s19 = sshll.u32 %s2104_s0, 6 }
  0x44   : > { %433 = vst.msk [vmem:[#allocation3] sm:$0xff] %vm431_vm0, %v1929_v0  ;;  %500 = vmatpush.bf16.msra.mxu1 %v2132_v2  ;;  %585 = vmatpush.bf16.msra.mxu3 %v2132_v2  ;;  %v445_v7 = vld [vmem:[%s2108_s10] sm:$0xf]  ;;  %v2163_v8 = vld [vmem:[%s360_s13] ss:$0 sm:$0xff]  ;;  %s2264_s8 = scalar_lea.vmem [#allocation12], %s1421_s19 }
  0x45   : > { %v1443_v37 = vld [vmem:[%s2108_s10 + $0x4] sm:$0xf]  ;;  %s1932_s16 = smov 96   ;;  %s1422_s7 = sshll.u32 %s2104_s0, 3 }
  0x46   : > { %s423_s30 = scalar_lea.vmem [#allocation15], %s1422_s7  ;;  %s1483_s1 = sshll.u32 %s1917_s24, 3 }
  0x47   : > { %472 = vmatpush.bf16.msra.mxu0 %v2134_v3  ;;  %566 = vmatpush.bf16.msra.mxu2 %v2134_v3  ;;  %s1176_s23 = scalar_lea.hbm %s2390_s5, %s1483_s1  ;;  %s1161_s26 = sshll.u32 %s2264_s8, 4  ;;  %s2315_s26 = int_to_ptr.vmem [resolvable:$true] %s1161_s26 }
  0x48   : > { %501 = vmatpush.bf16.msra.mxu1 %v2138_v4  ;;  %586 = vmatpush.bf16.msra.mxu3 %v2138_v4  ;;  %s1494_s29 = sshll.u32 %s1917_s24, 6  ;;  %s416_s11 = scalar_lea.vmem [#allocation13], %s1422_s7 }
  0x49   : > { %s1178_s12 = sshll.u32 %s416_s11, 4  ;;  %s1180_s13 = sshll.u32 %s1176_s23, 4  ;;  %s1179_s12 = int_to_ptr.vmem [resolvable:$true] %s1178_s12  ;;  %s1181_s13 = int_to_ptr.hbm [resolvable:$true] %s1180_s13 }
  0x4a   : > { %v443_v5 = vld [vmem:[#allocation2] sm:$0xff]  ;;  %1432 = vmatmul.msk.bf16.vlgmr.msra.gmra.mxu0 %vm431_vm0, %v445_v7  ;;  %1444 = vmatmul.msk.bf16.vlgmr.msra.gmra.mxu2 %vm431_vm0, %v1443_v37  ;;  %s1192_s14 = sshll.u32 %s423_s30, 4  ;;  %s2425_s19 = sld [smem:[#allocation30_spill]]  ;;  %s2311_s14 = int_to_ptr.vmem [resolvable:$true] %s1192_s14 }
  0x4b   : > { %v478_v6 = vpack.c.bf16 %v443_v5, %v443_v5  ;;  %647 = vmatpush.bf16.msrb.mxu0 %v2130_v1  ;;  %729 = vmatpush.bf16.msrb.mxu2 %v2130_v1  ;;  %v444_v16 = vld [vmem:[#allocation3] sm:$0xff]  ;;  %s2427_s7 = sand.u32 1, %s2001_s27   ;;  %s1795_s21 = scalar_lea.hbm %s2390_s5, 16 }
  0x4c   : > { %667 = vmatpush.bf16.msrb.mxu1 %v2132_v2  ;;  %749 = vmatpush.bf16.msrb.mxu3 %v2132_v2 }
  0x4d   : > { %1441 = vmatmul.msk.bf16.vlgmr.msra.gmra.mxu1 %vm431_vm0, %v478_v6 }
  0x4f   : > { %648 = vmatpush.bf16.msrb.mxu0 %v2134_v3  ;;  %730 = vmatpush.bf16.msrb.mxu2 %v2134_v3 }
  0x50   : > { %668 = vmatpush.bf16.msrb.mxu1 %v2138_v4  ;;  %750 = vmatpush.bf16.msrb.mxu3 %v2138_v4  ;;  %s2306_s4 = scalar_lea.hbm %s2425_s19, %s1494_s29 }
  0x51   : > { %s1163_s24 = sshll.u32 %s2306_s4, 4  ;;  %s1164_s24 = int_to_ptr.hbm [resolvable:$true] %s1163_s24 }
  0x53   : > { %811 = vmatpush.bf16.msra.mxu0 %v2130_v1  ;;  %893 = vmatpush.bf16.msra.mxu2 %v2130_v1 }
  0x54   : > { %831 = vmatpush.bf16.msra.mxu1 %v2132_v2 }
  0x57   : > { %812 = vmatpush.bf16.msra.mxu0 %v2134_v3  ;;  %894 = vmatpush.bf16.msra.mxu2 %v2134_v3 }
  0x58   : > { %832 = vmatpush.bf16.msra.mxu1 %v2138_v4 }
  0xc7   : > { %v474_v9 = vpop.f32.mrf.mxu0 }
  0xc8   : > { %v475_v11 = vadd.f32 %v2163_v8, %v474_v9  ;;  %v1448_v9 = vld [vmem:[%s2108_s10 + $0x8] sm:$0xf] }
  0xc9   : > { %1449 = vmatmul.msk.bf16.vlgmr.msrb.gmra.mxu0 %vm431_vm0, %v1448_v9  ;;  %v1458_v9 = vld [vmem:[%s2108_s10 + $0x10] sm:$0xf] }
  0xca   : > { %v503_v10 = vpop.f32.mrf.mxu1  ;;  %975 = vmatpush.bf16.msrb.mxu0 %v2130_v1 }
  0xcb   : > { %v507_v12 = vadd.f32 %v503_v10, %v475_v11 }
  0xcd   : > { %1591 = vtanh.f32 %v507_v12  ;;  %v1442_v17 = vmul.f32 -1.442695, %v507_v12  ;;  %v568_v42 = vpop.f32.mrf.mxu2 }
  0xce   : > { %v569_v44 = vadd.f32 %v2163_v8, %v568_v42  ;;  %976 = vmatpush.bf16.msrb.mxu0 %v2134_v3 }
  0xcf   : > { %v476_v13 = vpop.f32.mrf.mxu0  ;;  %1593 = vpow2.f32 %v1442_v17 }
  0xd2   : > { %v505_v14 = vpop.f32.mrf.mxu1 }
  0xd3   : > { %v1592_v15 = vpop.eup %1591 }
  0xd4   : > { %534 = vrot.lane.b32.xlu0 %v1592_v15, %s1930_s9 }
  0xd5   : > { %v1594_v18 = vpop.eup %1593  ;;  %v570_v43 = vpop.f32.mrf.mxu2 }
  0xd6   : > { %v511_v19 = vadd.f32 1.0, %v1594_v18 }
  0xd8   : > { %1595 = vrcp.f32 %v511_v19  ;;  %v523_v25 = vand.u32 2147483648, %v511_v19  ;;  %vm517_vm2 = vweird.f32 %v511_v19  ;;  %v521_v26 = vand.u32 2147483647, %v511_v19 }
  0xd9   : > { %1459 = vmatmul.msk.bf16.vlgmr.msra.gmra.mxu0 %vm431_vm0, %v1458_v9 }
  0xda   : > { %v524_v28 = vor.u32 1.1754944e-38, %v523_v25  ;;  %vm522_vm4 = vcmp.eq.f32.partialorder %v521_v26, 8.507059e+37 }
  0xdc   : > { %529 = vrot.lane.b32.xlu0 %v444_v16, %s1931_s18 }
  0xde   : > { %v1596_v20 = vpop.eup %1595 }
  0xdf   : > { %v513_v21 = vmul.f32 %v1596_v20, %v511_v19  ;;  %vm518_vm1 = vweird.f32 %v1596_v20 }
  0xe0   : > { %vm519_vm3 = vmor %vm517_vm2, %vm518_vm1 }
  0xe1   : > { %v514_v22 = vsub.f32 1.0, %v513_v21 }
  0xe3   : > { %v515_v23 = vmul.f32 %v1596_v20, %v514_v22 }
  0xe5   : > { %v516_v24 = vadd.f32 %v1596_v20, %v515_v23 }
  0xe7   : > { %v520_v27 = vsel %vm519_vm3, %v1596_v20, %v516_v24 }
  0xe8   : > { %v525_v30 = vsel %vm522_vm4, %v524_v28, %v520_v27 }
 0x146   : > { %v535_v29 = vpop.permute.xlu0 %534  ;;  %v650_v14 = vpop.f32.mrf.mxu0 }
 0x147   : > { %v537_v31 = vmul.f32 %v535_v29, %v525_v30  ;;  %v651_v16 = vadd.f32 %v2163_v8, %v650_v14 }
 0x149   : > { %539 = vrot.lane.b32.xlu1 %v537_v31, %s1931_s18 }
 0x14e   : > { %v530_v32 = vpop.permute.xlu0 %529  ;;  %v652_v15 = vpop.f32.mrf.mxu0 }
 0x14f   : > { %v532_v33 = vmul.f32 %v530_v32, %v525_v30 }
 0x156   : > { %v814_v14 = vpop.f32.mrf.mxu0 }
 0x15e   : > { %v816_v15 = vpop.f32.mrf.mxu0 }
 0x1bb   : > { %v540_v34 = vpop.permute.xlu1 %539 }
 0x1bc   : > { %v542_v35 = vadd.f32 %v540_v34, %v532_v33 }
 0x1be   : > { %1597 = vtanh.f32 %v542_v35 }
 0x1c4   : > { %v1598_v36 = vpop.eup %1597 }
 0x1c5   : > { %545 = vrot.lane.b32.xlu1 %v1598_v36, %s1930_s9 }
 0x237   : > { %v546_v38 = vpop.permute.xlu1 %545 }
 0x238   : > { %v2174_v39 = vmul.f32 %v546_v38, %v525_v30 }
 0x23a   : > { %v572_v40 = vpack.c.bf16 %v2174_v39, %v2174_v39 }
 0x23c   : > { %574 = vrot.lane.b32.xlu2 %v572_v40, %s1931_s18 }
 0x296   : > { %v575_v41 = vpop.permute.xlu2 %574 }
 0x297   : > { %1445 = vmatmul.msk.bf16.vlgmr.msra.gmra.mxu3 %vm431_vm0, %v575_v41  ;;  %v1453_v41 = vld [vmem:[%s2108_s10 + $0xc] sm:$0xf] }
 0x298   : > { %913 = vmatpush.bf16.msra.mxu3 %v2132_v2  ;;  %1454 = vmatmul.msk.bf16.vlgmr.msrb.gmra.mxu2 %vm431_vm0, %v1453_v41 }
 0x299   : > { %1057 = vmatpush.bf16.msrb.mxu2 %v2130_v1 }
 0x29c   : > { %914 = vmatpush.bf16.msra.mxu3 %v2138_v4 }
 0x29d   : > { %1058 = vmatpush.bf16.msrb.mxu2 %v2134_v3 }
 0x31a   : > { %v588_v45 = vpop.f32.mrf.mxu3 }
 0x31b   : > { %v592_v46 = vadd.f32 %v588_v45, %v569_v44  ;;  %v732_v45 = vpop.f32.mrf.mxu2 }
 0x31c   : > { %v733_v1 = vadd.f32 %v2163_v8, %v732_v45 }
 0x31d   : > { %1599 = vtanh.f32 %v592_v46  ;;  %v1446_v49 = vmul.f32 -1.442695, %v592_v46 }
 0x31f   : > { %1601 = vpow2.f32 %v1446_v49 }
 0x322   : > { %v590_v47 = vpop.f32.mrf.mxu3 }
 0x323   : > { %v1600_v48 = vpop.eup %1599  ;;  %v734_v46 = vpop.f32.mrf.mxu2 }
 0x324   : > { %615 = vrot.lane.b32.xlu2 %v1600_v48, %s1930_s9 }
 0x325   : > { %v1602_v50 = vpop.eup %1601 }
 0x326   : > { %v596_v51 = vadd.f32 1.0, %v1602_v50 }
 0x328   : > { %1603 = vrcp.f32 %v596_v51  ;;  %v608_v57 = vand.u32 2147483648, %v596_v51  ;;  %vm602_vm6 = vweird.f32 %v596_v51  ;;  %v606_v58 = vand.u32 2147483647, %v596_v51 }
 0x32a   : > { %v609_v60 = vor.u32 1.1754944e-38, %v608_v57  ;;  %vm607_vm8 = vcmp.eq.f32.partialorder %v606_v58, 8.507059e+37 }
 0x32e   : > { %v1604_v52 = vpop.eup %1603 }
 0x32f   : > { %v598_v53 = vmul.f32 %v1604_v52, %v596_v51  ;;  %vm603_vm5 = vweird.f32 %v1604_v52 }
 0x330   : > { %vm604_vm7 = vmor %vm602_vm6, %vm603_vm5 }
 0x331   : > { %v599_v54 = vsub.f32 1.0, %v598_v53 }
 0x333   : > { %v600_v55 = vmul.f32 %v1604_v52, %v599_v54 }
 0x335   : > { %v601_v56 = vadd.f32 %v1604_v52, %v600_v55 }
 0x337   : > { %v605_v59 = vsel %vm604_vm7, %v1604_v52, %v601_v56 }
 0x338   : > { %v610_v62 = vsel %vm607_vm8, %v609_v60, %v605_v59 }
 0x339   : > { %v613_v0 = vmul.f32 %v610_v62, %v542_v35 }
 0x37e   : > { %v616_v61 = vpop.permute.xlu2 %615 }
 0x37f   : > { %v618_v63 = vmul.f32 %v616_v61, %v610_v62 }
 0x381   : > { %620 = vrot.lane.b32.xlu0 %v618_v63, %s1931_s18 }
 0x3f3   : > { %v621_v5 = vpop.permute.xlu0 %620 }
 0x3f4   : > { %v623_v6 = vadd.f32 %v621_v5, %v613_v0 }
 0x3f6   : > { %1605 = vtanh.f32 %v623_v6 }
 0x3fc   : > { %v1606_v7 = vpop.eup %1605 }
 0x3fd   : > { %626 = vrot.lane.b32.xlu1 %v1606_v7, %s1930_s9 }
 0x46f   : > { %v627_v10 = vpop.permute.xlu1 %626 }
 0x470   : > { %v2190_v11 = vmul.f32 %v627_v10, %v610_v62 }
 0x472   : > { %v654_v12 = vpack.c.bf16 %v2190_v11, %v2190_v11 }
 0x474   : > { %656 = vrot.lane.b32.xlu2 %v654_v12, %s1931_s18 }
 0x4ce   : > { %v657_v13 = vpop.permute.xlu2 %656 }
 0x4cf   : > { %1450 = vmatmul.msk.bf16.vlgmr.msrb.gmra.mxu1 %vm431_vm0, %v657_v13 }
 0x4d0   : > { %995 = vmatpush.bf16.msrb.mxu1 %v2132_v2 }
 0x4d4   : > { %996 = vmatpush.bf16.msrb.mxu1 %v2138_v4 }
 0x54c   : > { %v670_v17 = vpop.f32.mrf.mxu1 }
 0x54d   : > { %v674_v18 = vadd.f32 %v670_v17, %v651_v16  ;;  %v815_v17 = vadd.f32 %v2163_v8, %v814_v14 }
 0x54f   : > { %1607 = vtanh.f32 %v674_v18  ;;  %v1451_v21 = vmul.f32 -1.442695, %v674_v18 }
 0x551   : > { %1609 = vpow2.f32 %v1451_v21 }
 0x554   : > { %v672_v19 = vpop.f32.mrf.mxu1 }
 0x555   : > { %v1608_v20 = vpop.eup %1607 }
 0x556   : > { %697 = vrot.lane.b32.xlu0 %v1608_v20, %s1930_s9 }
 0x557   : > { %v1610_v22 = vpop.eup %1609 }
 0x558   : > { %v678_v23 = vadd.f32 1.0, %v1610_v22 }
 0x55a   : > { %1611 = vrcp.f32 %v678_v23  ;;  %v690_v29 = vand.u32 2147483648, %v678_v23  ;;  %vm684_vm10 = vweird.f32 %v678_v23  ;;  %v688_v30 = vand.u32 2147483647, %v678_v23 }
 0x55c   : > { %v691_v32 = vor.u32 1.1754944e-38, %v690_v29  ;;  %vm689_vm12 = vcmp.eq.f32.partialorder %v688_v30, 8.507059e+37 }
 0x560   : > { %v1612_v24 = vpop.eup %1611 }
 0x561   : > { %v680_v25 = vmul.f32 %v1612_v24, %v678_v23  ;;  %vm685_vm9 = vweird.f32 %v1612_v24 }
 0x562   : > { %vm686_vm11 = vmor %vm684_vm10, %vm685_vm9 }
 0x563   : > { %v681_v26 = vsub.f32 1.0, %v680_v25 }
 0x565   : > { %v682_v27 = vmul.f32 %v1612_v24, %v681_v26 }
 0x567   : > { %v683_v28 = vadd.f32 %v1612_v24, %v682_v27 }
 0x569   : > { %v687_v31 = vsel %vm686_vm11, %v1612_v24, %v683_v28 }
 0x56a   : > { %v692_v34 = vsel %vm689_vm12, %v691_v32, %v687_v31 }
 0x56b   : > { %v695_v36 = vmul.f32 %v692_v34, %v623_v6 }
 0x5c8   : > { %v698_v33 = vpop.permute.xlu0 %697 }
 0x5c9   : > { %v700_v35 = vmul.f32 %v698_v33, %v692_v34 }
 0x5cb   : > { %702 = vrot.lane.b32.xlu1 %v700_v35, %s1931_s18 }
 0x63d   : > { %v703_v37 = vpop.permute.xlu1 %702 }
 0x63e   : > { %v705_v38 = vadd.f32 %v703_v37, %v695_v36 }
 0x640   : > { %1613 = vtanh.f32 %v705_v38 }
 0x646   : > { %v1614_v40 = vpop.eup %1613 }
 0x647   : > { %708 = vrot.lane.b32.xlu2 %v1614_v40, %s1930_s9 }
 0x6a1   : > { %v709_v42 = vpop.permute.xlu2 %708 }
 0x6a2   : > { %v2206_v43 = vmul.f32 %v709_v42, %v692_v34  ;;  %v1463_v42 = vld [vmem:[%s2108_s10 + $0x14] sm:$0xf] }
 0x6a3   : > { %1464 = vmatmul.msk.bf16.vlgmr.msra.gmra.mxu2 %vm431_vm0, %v1463_v42 }
 0x6a4   : > { %v736_v44 = vpack.c.bf16 %v2206_v43, %v2206_v43 }
 0x6a6   : > { %738 = vrot.lane.b32.xlu0 %v736_v44, %s1931_s18 }
 0x718   : > { %v739_v47 = vpop.permute.xlu0 %738 }
 0x719   : > { %1455 = vmatmul.msk.bf16.vlgmr.msrb.gmra.mxu3 %vm431_vm0, %v739_v47 }
 0x71a   : > { %1077 = vmatpush.bf16.msrb.mxu3 %v2132_v2 }
 0x71e   : > { %1078 = vmatpush.bf16.msrb.mxu3 %v2138_v4 }
 0x79c   : > { %v752_v3 = vpop.f32.mrf.mxu3 }
 0x79d   : > { %v756_v48 = vadd.f32 %v752_v3, %v733_v1  ;;  %v896_v1 = vpop.f32.mrf.mxu2 }
 0x79f   : > { %1615 = vtanh.f32 %v756_v48  ;;  %v1456_v51 = vmul.f32 -1.442695, %v756_v48  ;;  %v897_v48 = vadd.f32 %v2163_v8, %v896_v1 }
 0x7a1   : > { %1617 = vpow2.f32 %v1456_v51 }
 0x7a4   : > { %v754_v49 = vpop.f32.mrf.mxu3 }
 0x7a5   : > { %v1616_v50 = vpop.eup %1615  ;;  %v898_v3 = vpop.f32.mrf.mxu2 }
 0x7a6   : > { %779 = vrot.lane.b32.xlu1 %v1616_v50, %s1930_s9 }
 0x7a7   : > { %v1618_v52 = vpop.eup %1617 }
 0x7a8   : > { %v760_v53 = vadd.f32 1.0, %v1618_v52 }
 0x7aa   : > { %1619 = vrcp.f32 %v760_v53  ;;  %v772_v4 = vand.u32 2147483648, %v760_v53  ;;  %vm766_vm14 = vweird.f32 %v760_v53  ;;  %v770_v58 = vand.u32 2147483647, %v760_v53 }
 0x7ac   : > { %v773_v60 = vor.u32 1.1754944e-38, %v772_v4  ;;  %vm771_vm1 = vcmp.eq.f32.partialorder %v770_v58, 8.507059e+37 }
 0x7b0   : > { %v1620_v54 = vpop.eup %1619 }
 0x7b1   : > { %v762_v55 = vmul.f32 %v1620_v54, %v760_v53  ;;  %vm767_vm13 = vweird.f32 %v1620_v54 }
 0x7b2   : > { %vm768_vm15 = vmor %vm766_vm14, %vm767_vm13 }
 0x7b3   : > { %v763_v56 = vsub.f32 1.0, %v762_v55 }
 0x7b5   : > { %v764_v2 = vmul.f32 %v1620_v54, %v763_v56 }
 0x7b7   : > { %v765_v57 = vadd.f32 %v1620_v54, %v764_v2 }
 0x7b9   : > { %v769_v59 = vsel %vm768_vm15, %v1620_v54, %v765_v57 }
 0x7ba   : > { %v774_v62 = vsel %vm771_vm1, %v773_v60, %v769_v59 }
 0x7bb   : > { %v777_v0 = vmul.f32 %v774_v62, %v705_v38 }
 0x818   : > { %v780_v61 = vpop.permute.xlu1 %779 }
 0x819   : > { %v782_v63 = vmul.f32 %v780_v61, %v774_v62 }
 0x81b   : > { %784 = vrot.lane.b32.xlu2 %v782_v63, %s1931_s18 }
 0x875   : > { %v785_v5 = vpop.permute.xlu2 %784 }
 0x876   : > { %v787_v6 = vadd.f32 %v785_v5, %v777_v0 }
 0x878   : > { %1621 = vtanh.f32 %v787_v6 }
 0x87e   : > { %v1622_v7 = vpop.eup %1621 }
 0x87f   : > { %790 = vrot.lane.b32.xlu0 %v1622_v7, %s1930_s9 }
 0x8f1   : > { %v791_v10 = vpop.permute.xlu0 %790 }
 0x8f2   : > { %v2220_v12 = vmul.f32 %v791_v10, %v774_v62 }
 0x8f4   : > { %v818_v13 = vpack.c.bf16 %v2220_v12, %v2220_v12 }
 0x8f6   : > { %820 = vrot.lane.b32.xlu1 %v818_v13, %s1931_s18  ;;  %v1468_v13 = vld [vmem:[%s2108_s10 + $0x18] sm:$0xf] }
 0x8f7   : > { %1469 = vmatmul.msk.bf16.vlgmr.msrb.gmra.mxu0 %vm431_vm0, %v1468_v13 }
 0x968   : > { %v821_v16 = vpop.permute.xlu1 %820 }
 0x969   : > { %1460 = vmatmul.msk.bf16.vlgmr.msra.gmra.mxu1 %vm431_vm0, %v821_v16 }
 0x9e6   : > { %v834_v18 = vpop.f32.mrf.mxu1 }
 0x9e7   : > { %v838_v19 = vadd.f32 %v834_v18, %v815_v17  ;;  %v978_v17 = vpop.f32.mrf.mxu0 }
 0x9e9   : > { %1623 = vtanh.f32 %v838_v19  ;;  %v1461_v22 = vmul.f32 -1.442695, %v838_v19 }
 0x9eb   : > { %1625 = vpow2.f32 %v1461_v22 }
 0x9ee   : > { %v836_v20 = vpop.f32.mrf.mxu1 }
 0x9ef   : > { %v1624_v21 = vpop.eup %1623  ;;  %v980_v18 = vpop.f32.mrf.mxu0  ;;  %v979_v20 = vadd.f32 %v2163_v8, %v978_v17 }
 0x9f0   : > { %861 = vrot.lane.b32.xlu2 %v1624_v21, %s1930_s9 }
 0x9f1   : > { %v1626_v23 = vpop.eup %1625 }
 0x9f2   : > { %v842_v24 = vadd.f32 1.0, %v1626_v23 }
 0x9f4   : > { %1627 = vrcp.f32 %v842_v24  ;;  %v854_v30 = vand.u32 2147483648, %v842_v24  ;;  %vm848_vm3 = vweird.f32 %v842_v24  ;;  %v852_v31 = vand.u32 2147483647, %v842_v24 }
 0x9f6   : > { %v855_v33 = vor.u32 1.1754944e-38, %v854_v30  ;;  %vm853_vm5 = vcmp.eq.f32.partialorder %v852_v31, 8.507059e+37 }
 0x9fa   : > { %v1628_v25 = vpop.eup %1627 }
 0x9fb   : > { %v844_v26 = vmul.f32 %v1628_v25, %v842_v24  ;;  %vm849_vm2 = vweird.f32 %v1628_v25 }
 0x9fc   : > { %vm850_vm4 = vmor %vm848_vm3, %vm849_vm2 }
 0x9fd   : > { %v845_v27 = vsub.f32 1.0, %v844_v26 }
 0x9ff   : > { %v846_v28 = vmul.f32 %v1628_v25, %v845_v27 }
 0xa01   : > { %v847_v29 = vadd.f32 %v1628_v25, %v846_v28 }
 0xa03   : > { %v851_v32 = vsel %vm850_vm4, %v1628_v25, %v847_v29 }
 0xa04   : > { %v856_v35 = vsel %vm853_vm5, %v855_v33, %v851_v32 }
 0xa05   : > { %v859_v37 = vmul.f32 %v856_v35, %v787_v6 }
 0xa4a   : > { %v862_v34 = vpop.permute.xlu2 %861 }
 0xa4b   : > { %v864_v36 = vmul.f32 %v862_v34, %v856_v35 }
 0xa4d   : > { %866 = vrot.lane.b32.xlu0 %v864_v36, %s1931_s18 }
 0xabf   : > { %v867_v38 = vpop.permute.xlu0 %866 }
 0xac0   : > { %v869_v40 = vadd.f32 %v867_v38, %v859_v37 }
 0xac2   : > { %1629 = vtanh.f32 %v869_v40 }
 0xac8   : > { %v1630_v41 = vpop.eup %1629 }
 0xac9   : > { %872 = vrot.lane.b32.xlu1 %v1630_v41, %s1930_s9 }
 0xb3b   : > { %v873_v44 = vpop.permute.xlu1 %872 }
 0xb3c   : > { %v2232_v45 = vmul.f32 %v873_v44, %v856_v35 }
 0xb3e   : > { %v900_v46 = vpack.c.bf16 %v2232_v45, %v2232_v45 }
 0xb40   : > { %902 = vrot.lane.b32.xlu2 %v900_v46, %s1931_s18 }
 0xb9a   : > { %v903_v47 = vpop.permute.xlu2 %902 }
 0xb9b   : > { %1465 = vmatmul.msk.bf16.vlgmr.msra.gmra.mxu3 %vm431_vm0, %v903_v47  ;;  %v1473_v47 = vld [vmem:[%s2108_s10 + $0x1c] sm:$0xf]  ;;  %s1190_s10 = scalar_lea.hbm %s2391_s6, %s1483_s1  ;;  %s1789_s1 = sshra.s32 %s1181_s13, 4  ;;  %s1790_s1 = int_to_ptr.hbm [resolvable:$true] %s1789_s1 }
 0xb9c   : > { %1474 = vmatmul.msk.bf16.vlgmr.msrb.gmra.mxu2 %vm431_vm0, %v1473_v47  ;;  %s1194_s17 = sshll.u32 %s1190_s10, 4  ;;  %s1791_s20 = scalar_lea.hbm %s1790_s1, 8  ;;  %s2313_s17 = int_to_ptr.hbm [resolvable:$true] %s1194_s17 }
 0xb9d   : > { %p1792_p4 = scmp.ne.s32.totalorder %s1790_s1, %s1791_s20  ;;  %p1796_p7 = scmp.lt.s32.totalorder %s1790_s1, %s2390_s5 }
 0xb9e   : > { %p1797_p8 = scmp.lt.s32.totalorder %s1795_s21, %s1791_s20 }
 0xb9f   : > { %p1793_p5 = pnand %p1792_p4, %p2025_p9 }
 0xba0   : > { %p1798_p10 = por %p1797_p8, %p1796_p7 }
 0xba1   : > { %p1794_p6 = pneg %p1793_p5 }
 0xba3   : > { %p1799_p13 = pnand %p1798_p10, %p1794_p6 }
 0xc1e   : > { %v916_v49 = vpop.f32.mrf.mxu3 }
 0xc1f   : > { %v920_v50 = vadd.f32 %v916_v49, %v897_v48  ;;  %v1060_v49 = vpop.f32.mrf.mxu2 }
 0xc21   : > { %1631 = vtanh.f32 %v920_v50  ;;  %v1466_v53 = vmul.f32 -1.442695, %v920_v50 }
 0xc23   : > { %1633 = vpow2.f32 %v1466_v53 }
 0xc26   : > { %v918_v51 = vpop.f32.mrf.mxu3 }
 0xc27   : > { %v1632_v52 = vpop.eup %1631  ;;  %v1062_v50 = vpop.f32.mrf.mxu2 }
 0xc28   : > { %943 = vrot.lane.b32.xlu0 %v1632_v52, %s1930_s9  ;;  %v1061_v52 = vadd.f32 %v2163_v8, %v1060_v49 }
 0xc29   : > { %v1634_v54 = vpop.eup %1633 }
 0xc2a   : > { %v924_v55 = vadd.f32 1.0, %v1634_v54 }
 0xc2c   : > { %1635 = vrcp.f32 %v924_v55  ;;  %v936_v59 = vand.u32 2147483648, %v924_v55  ;;  %vm930_vm7 = vweird.f32 %v924_v55  ;;  %v934_v60 = vand.u32 2147483647, %v924_v55 }
 0xc2e   : > { %v937_v62 = vor.u32 1.1754944e-38, %v936_v59  ;;  %vm935_vm9 = vcmp.eq.f32.partialorder %v934_v60, 8.507059e+37 }
 0xc32   : > { %v1636_v56 = vpop.eup %1635 }
 0xc33   : > { %v926_v2 = vmul.f32 %v1636_v56, %v924_v55  ;;  %vm931_vm6 = vweird.f32 %v1636_v56 }
 0xc34   : > { %vm932_vm8 = vmor %vm930_vm7, %vm931_vm6 }
 0xc35   : > { %v927_v57 = vsub.f32 1.0, %v926_v2 }
 0xc37   : > { %v928_v4 = vmul.f32 %v1636_v56, %v927_v57 }
 0xc39   : > { %v929_v58 = vadd.f32 %v1636_v56, %v928_v4 }
 0xc3b   : > { %v933_v61 = vsel %vm932_vm8, %v1636_v56, %v929_v58 }
 0xc3c   : > { %v938_v0 = vsel %vm935_vm9, %v937_v62, %v933_v61 }
 0xc3d   : > { %v941_v6 = vmul.f32 %v938_v0, %v869_v40 }
 0xc9a   : > { %v944_v63 = vpop.permute.xlu0 %943 }
 0xc9b   : > { %v946_v5 = vmul.f32 %v944_v63, %v938_v0 }
 0xc9d   : > { %948 = vrot.lane.b32.xlu1 %v946_v5, %s1931_s18 }
 0xd0f   : > { %v949_v7 = vpop.permute.xlu1 %948 }
 0xd10   : > { %v951_v9 = vadd.f32 %v949_v7, %v941_v6 }
 0xd12   : > { %1637 = vtanh.f32 %v951_v9 }
 0xd18   : > { %v1638_v10 = vpop.eup %1637 }
 0xd19   : > { %954 = vrot.lane.b32.xlu2 %v1638_v10, %s1930_s9 }
 0xd73   : > { %v955_v14 = vpop.permute.xlu2 %954 }
 0xd74   : > { %v2244_v15 = vmul.f32 %v955_v14, %v938_v0 }
 0xd76   : > { %v982_v16 = vpack.c.bf16 %v2244_v15, %v2244_v15 }
 0xd78   : > { %984 = vrot.lane.b32.xlu0 %v982_v16, %s1931_s18 }
 0xdea   : > { %v985_v19 = vpop.permute.xlu0 %984 }
 0xdeb   : > { %1470 = vmatmul.msk.bf16.vlgmr.msrb.gmra.mxu1 %vm431_vm0, %v985_v19 }
 0xe68   : > { %v998_v21 = vpop.f32.mrf.mxu1 }
 0xe69   : > { %v1002_v22 = vadd.f32 %v998_v21, %v979_v20 }
 0xe6b   : > { %1639 = vtanh.f32 %v1002_v22  ;;  %v1471_v25 = vmul.f32 -1.442695, %v1002_v22 }
 0xe6d   : > { %1641 = vpow2.f32 %v1471_v25 }
 0xe70   : > { %v1000_v23 = vpop.f32.mrf.mxu1 }
 0xe71   : > { %v1640_v24 = vpop.eup %1639 }
 0xe72   : > { %1025 = vrot.lane.b32.xlu1 %v1640_v24, %s1930_s9 }
 0xe73   : > { %v1642_v26 = vpop.eup %1641 }
 0xe74   : > { %v1006_v27 = vadd.f32 1.0, %v1642_v26 }
 0xe76   : > { %1643 = vrcp.f32 %v1006_v27  ;;  %v1018_v33 = vand.u32 2147483648, %v1006_v27  ;;  %vm1012_vm11 = vweird.f32 %v1006_v27  ;;  %v1016_v34 = vand.u32 2147483647, %v1006_v27 }
 0xe78   : > { %v1019_v36 = vor.u32 1.1754944e-38, %v1018_v33  ;;  %vm1017_vm13 = vcmp.eq.f32.partialorder %v1016_v34, 8.507059e+37 }
 0xe7c   : > { %v1644_v28 = vpop.eup %1643 }
 0xe7d   : > { %v1008_v29 = vmul.f32 %v1644_v28, %v1006_v27  ;;  %vm1013_vm10 = vweird.f32 %v1644_v28 }
 0xe7e   : > { %vm1014_vm12 = vmor %vm1012_vm11, %vm1013_vm10 }
 0xe7f   : > { %v1009_v30 = vsub.f32 1.0, %v1008_v29 }
 0xe81   : > { %v1010_v31 = vmul.f32 %v1644_v28, %v1009_v30 }
 0xe83   : > { %v1011_v32 = vadd.f32 %v1644_v28, %v1010_v31 }
 0xe85   : > { %v1015_v35 = vsel %vm1014_vm12, %v1644_v28, %v1011_v32 }
 0xe86   : > { %v1020_v38 = vsel %vm1017_vm13, %v1019_v36, %v1015_v35 }
 0xe87   : > { %v1023_v41 = vmul.f32 %v1020_v38, %v951_v9 }
 0xee4   : > { %v1026_v37 = vpop.permute.xlu1 %1025 }
 0xee5   : > { %v1028_v40 = vmul.f32 %v1026_v37, %v1020_v38 }
 0xee7   : > { %1030 = vrot.lane.b32.xlu2 %v1028_v40, %s1931_s18 }
 0xf41   : > { %v1031_v42 = vpop.permute.xlu2 %1030 }
 0xf42   : > { %v1033_v44 = vadd.f32 %v1031_v42, %v1023_v41 }
 0xf44   : > { %1645 = vtanh.f32 %v1033_v44 }
 0xf4a   : > { %v1646_v46 = vpop.eup %1645 }
 0xf4b   : > { %1036 = vrot.lane.b32.xlu0 %v1646_v46, %s1930_s9 }
 0xfbd   : > { %v1037_v1 = vpop.permute.xlu0 %1036 }
 0xfbe   : > { %v1039_v3 = vmul.f32 %v1037_v1, %v1020_v38 }
 0xfc0   : > { %v1064_v48 = vpack.c.bf16 %v1039_v3, %v1039_v3 }
 0xfc2   : > { %1066 = vrot.lane.b32.xlu1 %v1064_v48, %s1931_s18 }
0x1034   : > { %v1067_v51 = vpop.permute.xlu1 %1066 }
0x1035   : > { %1475 = vmatmul.msk.bf16.vlgmr.msrb.gmra.mxu3 %vm431_vm0, %v1067_v51 }
0x10b8   : > { %v1080_v53 = vpop.f32.mrf.mxu3 }
0x10b9   : > { %v1084_v54 = vadd.f32 %v1080_v53, %v1061_v52 }
0x10bb   : > { %1647 = vtanh.f32 %v1084_v54  ;;  %v1476_v2 = vmul.f32 -1.442695, %v1084_v54 }
0x10bd   : > { %1649 = vpow2.f32 %v1476_v2 }
0x10c0   : > { %v1082_v55 = vpop.f32.mrf.mxu3 }
0x10c1   : > { %v1648_v56 = vpop.eup %1647 }
0x10c2   : > { %1107 = vrot.lane.b32.xlu2 %v1648_v56, %s1930_s9 }
0x10c3   : > { %v1650_v57 = vpop.eup %1649 }
0x10c4   : > { %v1088_v4 = vadd.f32 1.0, %v1650_v57 }
0x10c6   : > { %1651 = vrcp.f32 %v1088_v4  ;;  %v1100_v62 = vand.u32 2147483648, %v1088_v4  ;;  %vm1094_vm15 = vweird.f32 %v1088_v4  ;;  %v1098_v63 = vand.u32 2147483647, %v1088_v4 }
0x10c8   : > { %v1101_v5 = vor.u32 1.1754944e-38, %v1100_v62  ;;  %vm1099_vm2 = vcmp.eq.f32.partialorder %v1098_v63, 8.507059e+37 }
0x10ca   : > { %713 = vrot.lane.b32.xlu2 %v2206_v43, %s1931_s18 }
0x10cc   : > { %v1652_v58 = vpop.eup %1651 }
0x10cd   : > { %v1090_v59 = vmul.f32 %v1652_v58, %v1088_v4  ;;  %vm1095_vm14 = vweird.f32 %v1652_v58 }
0x10ce   : > { %vm1096_vm1 = vmor %vm1094_vm15, %vm1095_vm14 }
0x10cf   : > { %v1091_v60 = vsub.f32 1.0, %v1090_v59 }
0x10d1   : > { %v1092_v8 = vmul.f32 %v1652_v58, %v1091_v60 }
0x10d3   : > { %v1093_v61 = vadd.f32 %v1652_v58, %v1092_v8 }
0x10d5   : > { %v1097_v0 = vsel %vm1096_vm1, %v1652_v58, %v1093_v61 }
0x10d6   : > { %v1102_v6 = vsel %vm1099_vm2, %v1101_v5, %v1097_v0 }
0x10d7   : > { %v1105_v10 = vmul.f32 %v1102_v6, %v1033_v44 }
0x111c   : > { %v1108_v43 = vpop.permute.xlu2 %1107 }
0x111d   : > { %v1110_v7 = vmul.f32 %v1108_v43, %v1102_v6 }
0x111f   : > { %1112 = vrot.lane.b32.xlu0 %v1110_v7, %s1931_s18 }
0x1124   : > { %v714_v9 = vpop.permute.xlu2 %713 }
0x1125   : > { %1452 = vst.msk [vmem:[%s2264_s8 + $0x10] sm:$0xff] %vm431_vm0, %v714_v9 }
0x1127   : > { %550 = vrot.lane.b32.xlu0 %v2174_v39, %s1931_s18 }
0x112f   : > { %795 = vrot.lane.b32.xlu0 %v2220_v12, %s1931_s18 }
0x1137   : > { %1041 = vrot.lane.b32.xlu0 %v1039_v3, %s1931_s18 }
0x1191   : > { %v1113_v13 = vpop.permute.xlu0 %1112 }
0x1192   : > { %v1115_v14 = vadd.f32 %v1113_v13, %v1105_v10 }
0x1194   : > { %1653 = vtanh.f32 %v1115_v14 }
0x1199   : > { %v551_v16 = vpop.permute.xlu0 %550 }
0x119a   : > { %v1654_v17 = vpop.eup %1653  ;;  %553 = vst.msk [vmem:[%s2264_s8] sm:$0xff] %vm431_vm0, %v551_v16 }
0x119b   : > { %1118 = vrot.lane.b32.xlu1 %v1654_v17, %s1930_s9 }
0x11a1   : > { %v796_v18 = vpop.permute.xlu0 %795 }
0x11a2   : > { %1457 = vst.msk [vmem:[%s2264_s8 + $0x18] sm:$0xff] %vm431_vm0, %v796_v18 }
0x11a3   : > { %631 = vrot.lane.b32.xlu1 %v2190_v11, %s1931_s18 }
0x11a9   : > { %v1042_v39 = vpop.permute.xlu0 %1041 }
0x11aa   : > { %1472 = vst.msk [vmem:[%s2264_s8 + $0x30] sm:$0xff] %vm431_vm0, %v1042_v39 }
0x11ab   : > { %877 = vrot.lane.b32.xlu1 %v2232_v45, %s1931_s18 }
0x11b3   : > { %1130 = vrot.lane.b32.xlu1 %v1115_v14, %s1932_s16 }
0x120d   : > { %v1119_v12 = vpop.permute.xlu1 %1118 }
0x120e   : > { %v1121_v19 = vmul.f32 %v1119_v12, %v1102_v6 }
0x1210   : > { %1123 = vrot.lane.b32.xlu2 %v1121_v19, %s1931_s18 }
0x1215   : > { %v632_v20 = vpop.permute.xlu1 %631 }
0x1216   : > { %1447 = vst.msk [vmem:[%s2264_s8 + $0x8] sm:$0xff] %vm431_vm0, %v632_v20 }
0x1218   : > { %959 = vrot.lane.b32.xlu2 %v2244_v15, %s1931_s18 }
0x121d   : > { %v878_v11 = vpop.permute.xlu1 %877 }
0x121e   : > { %1462 = vst.msk [vmem:[%s2264_s8 + $0x20] sm:$0xff] %vm431_vm0, %v878_v11 }
0x1225   : > { %v1131_v45 = vpop.permute.xlu1 %1130 }
0x1226   : > { %1133 = vst.msk [vmem:[#allocation3] sm:$0xff] %vm431_vm0, %v1131_v45 }
0x1227   : > { %1135 = vst.msk [vmem:[%s423_s30] sm:$0xff] %vm431_vm0, %v1131_v45  ;;  %s1142_s30 = scalar_lea.sflag [#allocation14], %s2427_s7 }
0x126a   : > { %v1124_v15 = vpop.permute.xlu2 %1123 }
0x126b   : > { %1477 = vst.msk [vmem:[%s2264_s8 + $0x38] sm:$0xff] %vm431_vm0, %v1124_v15 }
0x126c   : > { %1128 = vst.msk [vmem:[#allocation2] sm:$0xff] %vm431_vm0, %v1124_v15 }
0x126d   : > { %1134 = vst.msk [vmem:[%s416_s11] sm:$0xff] %vm431_vm0, %v1124_v15 }
0x126e   : > { %1802 = shalt.err (!%p1799_p13)
}
0x126f   : > { %1504 = dma.vmem_to_hbm [thread:$0]  (%p2025_p9), %s1179_s12, 128, %s1181_s13, %s1142_s30  }
0x1270   : > { %s1817_s27 = sshra.s32 %s2313_s17, 4  ;;  %s1823_s18 = scalar_lea.hbm %s2391_s6, 16  ;;  %s1818_s27 = int_to_ptr.hbm [resolvable:$true] %s1817_s27 }
0x1271   : > { %s1819_s29 = scalar_lea.hbm %s1818_s27, 8  ;;  %p1824_p3 = scmp.lt.s32.totalorder %s1818_s27, %s2391_s6 }
0x1272   : > { %p1820_p0 = scmp.ne.s32.totalorder %s1818_s27, %s1819_s29  ;;  %p1825_p4 = scmp.lt.s32.totalorder %s1823_s18, %s1819_s29 }
0x1274   : > { %p1821_p1 = pnand %p1820_p0, %p2025_p9  ;;  %p1826_p5 = por %p1825_p4, %p1824_p3 }
0x1276   : > { %p1822_p2 = pneg %p1821_p1 }
0x1278   : > { %p1827_p6 = pnand %p1826_p5, %p1822_p2 }
0x127a   : > { %1830 = shalt.err (!%p1827_p6)
}
0x127b   : > { %1505 = dma.vmem_to_hbm [thread:$0]  (%p2025_p9), %s2311_s14, 128, %s2313_s17, %s1142_s30   ;;  %v960_v21 = vpop.permute.xlu2 %959 }
0x127c   : > { %1467 = vst.msk [vmem:[%s2264_s8 + $0x28] sm:$0xff] %vm431_vm0, %v960_v21  ;;  %s1137_s12 = scalar_lea.sflag [#allocation6], %s2104_s0  ;;  %s1845_s13 = sshra.s32 %s1164_s24, 4  ;;  %s1846_s13 = int_to_ptr.hbm [resolvable:$true] %s1845_s13 }
0x127d   : > { %s1847_s20 = scalar_lea.hbm %s1846_s13, 64  ;;  %s1851_s21 = scalar_lea.hbm %s2425_s19, 128 }
0x127e   : > { %p1848_p7 = scmp.ne.s32.totalorder %s1846_s13, %s1847_s20  ;;  %p1852_p13 = scmp.lt.s32.totalorder %s1846_s13, %s2425_s19 }
0x127f   : > { %p1853_p0 = scmp.lt.s32.totalorder %s1851_s21, %s1847_s20 }
0x1280   : > { %p1849_p8 = pnand %p1848_p7, %p2025_p9 }
0x1281   : > { %p1854_p1 = por %p1853_p0, %p1852_p13 }
0x1282   : > { %p1850_p10 = pneg %p1849_p8 }
0x1284   : > { %p1855_p2 = pnand %p1854_p1, %p1850_p10 }
0x1286   : > { %1858 = shalt.err (!%p1855_p2)
}
0x1287   : > { %s1933_s0 = smov 128   ;;  %s1934_s4 = smov 8  }
0x1288   : > { %1503 = dma.vmem_to_hbm [thread:$0]  (%p2025_p9), %s2315_s26, 1024, %s1164_s24, %s1137_s12, %s1933_s0, %s1933_s0, %s1934_s4  }
0x1289 PF: > { %s2428_s8 = sld [smem:[#allocation21_spill]]  ;;  %p1523_p3 = pnand %p1407_p12, %p2034_p11 }
0x128a   : > { %s2430_s17 = sld [smem:[#allocation23_spill]] }
0x128b   : > { %p1524_p4 = pneg %p1523_p3 }
0x128f   : > { %s1206_s30 = sand.u32 1, %s2428_s8  }
0x1290   : > { %s1207_s27 = scalar_lea.sflag [#allocation6], %s1206_s30 }
0x1291   : > { %1896 = dma.done.wait (%p1524_p4), %s1207_s27, 1024  }
0x1292   : > { %1898 = vsyncadd (%p1524_p4), %s1207_s27, 4294966272  ;;  %s2431_s29 = sadd.s32 4294967294, %s2430_s17  }
0x1293   : > { %s1216_s11 = sand.u32 1, %s2431_s29  }
0x1294   : > { %s1217_s9 = scalar_lea.sflag [#allocation14], %s1216_s11 }
0x1295   : > { %1900 = dma.done.wait (%p1524_p4), %s1217_s9, 256  }
0x1296   : > { %1902 = vsyncadd (%p1524_p4), %s1217_s9, 4294967040  ;;  %s32_s26 = sadd.s32 1, %s2430_s17   ;;  %s2432_s16 = sld [smem:[#allocation22_spill]] }
0x1297   : > { %p29_p9 = scmp.ge.s32.totalorder %s32_s26, 4   ;;  %s2433_s23 = sld [smem:[#allocation26_spill]] }
0x1298   : > { %s2434_s18 = sld [smem:[#allocation24_spill]]  ;;  %s2435_s21 = smov %s1909_s22 }
0x1299   : > { %s2437_s24 = smov %s1921_s25 }
0x129a   :  { %31 = sbr.rel (!%p29_p9) target bundleno = 16 (0x10), region = 168 }
0x129c   : > { %s2436_s22 = smov %s2432_s16 }
0x129e   : > { %s2438_s25 = smov %s2434_s18 }
0x129f   :  { %1233 = vsyncpa [#allocation5], 1 }
0x12a0   :  { %1235 = vsyncpa [#allocation5 + $0x1], 1 }
0x12a1   :  { %1236 = vsyncpa [#allocation8], 1 }
0x12a2   :  { %1238 = vsyncpa [#allocation8 + $0x1], 1 }
0x12a3   :  { %1239 = vsyncpa [#allocation11], 1 }
0x12a4   :  { %1241 = vsyncpa [#allocation11 + $0x1], 1 }
0x12a5   :  { %1242 = vsyncpa [#allocation6], 1 }
0x12a6   :  { %1244 = vsyncpa [#allocation6 + $0x1], 1 }
0x12a7   :  { %1245 = vsyncpa [#allocation14], 1 }
0x12a8   :  { %1247 = vsyncpa [#allocation14 + $0x1], 1 }

</bundles_post_ra>
